<compile_context>
chip_gen: v7x
topology: tpu7x:2x2x1
jax: 0.10.0
libtpu: 0.0.40
codegen_flags: <defaults>
</compile_context>

<pallas_src>
import jax
import jax.numpy as jnp
from jax import lax
from jax.experimental import pallas as pl
from jax.experimental.pallas import tpu as pltpu

_LANES = 128
_STRIP = 16          # rows per compute strip: 2 f32 vregs per live temporary
_TM_MAX = 512        # rows per DMA block (64 vregs of data per channel)
_NEWTON_ITERS = 2

# Taylor coefficients of g(s) = cos((2/3)*acos(s)) around s = 0, where
# s = sqrt((1+r)/2); i.e. y = cos(acos(r)/3) in a variable analytic at r = -1.
_SQ3 = 1.7320508075688772
_C1 = _SQ3 / 3.0
_C2 = -1.0 / 9.0
_C3 = 5.0 * _SQ3 / 162.0
_C4 = -8.0 / 243.0
_C5 = _SQ3 * (1.0 / 40.0 - 1.0 / 81.0 + 2.0 / 3645.0)


def _largest_eig_and_trace(xx, xy, xz, yy, yz, zz):
    """Largest eigenvalue and trace of the symmetric 3x3 matrix, per element."""
    trace = xx + yy + zz
    q = trace * (1.0 / 3.0)
    a = xx - q
    d = yy - q
    f = zz - q
    p1 = xy * xy + xz * xz + yz * yz
    p2 = a * a + d * d + f * f + 2.0 * p1
    p2s = jnp.maximum(p2, 1e-20)
    u = p2s * (1.0 / 6.0)
    irt = lax.rsqrt(u)                       # EUP; 1/sqrt(u)
    p = u * irt                              # sqrt(u) without a second EUP op
    # det(A - q*I)
    det = a * (d * f - yz * yz) - xy * (xy * f - yz * xz) + xz * (xy * yz - d * xz)
    r = (det * 0.5) * (irt * irt) * irt      # det / (2 p^3)
    r = jnp.clip(r, -1.0, 1.0)

    # y = cos(acos(r)/3) is the largest root of 4y^3 - 3y = r, y in [0.5, 1].
    # Seed: degree-5 series in s = sqrt((1+r)/2) (accurate near the double-root
    # corner r = -1); two damped Newton steps reach ~f32 accuracy everywhere.
    s = jnp.sqrt(jnp.maximum(0.5 * (r + 1.0), 0.0))
    y = 0.5 + s * (_C1 + s * (_C2 + s * (_C3 + s * (_C4 + s * _C5))))
    for _ in range(_NEWTON_ITERS):
        y2 = y * y
        fy = (4.0 * y2 - 3.0) * y - r
        dfy = jnp.maximum(12.0 * y2 - 3.0, 1e-2)   # damped near the double root
        y = y - fy * pl.reciprocal(dfy, approx=True)
    y = jnp.clip(y, 0.5, 1.0)

    lam_max = q + 2.0 * p * y
    # Degenerate (near-isotropic / garbage-padded) matrices: all eigvals == q.
    lam_max = jnp.where(p2 > 1e-12, lam_max, q)
    return lam_max, trace


def _make_kernel(tm, rows_total, n_full, rem):
    """Build the kernel for a (1, 6, tm, 128) block; rows_total is the number of
    valid sublane rows in the whole (rows, 128) voxel grid (for ragged blocks)."""

    def kernel(mean_ref, std_ref, x_ref, t_ref, m_ref, sum_ref, cnt_ref):
        base_row = pl.program_id(1) * tm
        # Hoist the 12 SMEM scalar reads out of the strip loops.
        mean = [mean_ref[c] for c in range(6)]
        std = [std_ref[c] for c in range(6)]

        def sel_strip(r0, size):
            m = m_ref[0, 0, pl.ds(r0, size), :]
            grow = (base_row + r0
                    + lax.broadcasted_iota(jnp.int32, (size, _LANES), 0))
            # Exact ==1.0 selection (as in the reference) AND in-bounds row.
            return jnp.logical_and(m == 1.0, grow < rows_total)

        def count_strip(r0, size):
            sel = sel_strip(r0, size)
            return jnp.sum(jnp.where(sel, 1.0, 0.0), axis=0, keepdims=True)

        def diff_strip(r0, size):
            sel = sel_strip(r0, size)

            def scaled(ref):
                # x * gt_std + gt_mean (the reference's extra "* mask" is the
                # identity at the voxels kept by `sel`).
                return [ref[0, c, pl.ds(r0, size), :].astype(jnp.float32) * std[c]
                        + mean[c] for c in range(6)]

            # Finish the input eigen-solve before touching target channels.
            lam_x, tr_x = _largest_eig_and_trace(*scaled(x_ref))
            input_ani = 1.5 * lam_x - 0.5 * tr_x
            lam_t, tr_t = _largest_eig_and_trace(*scaled(t_ref))
            # NOTE: reproduces the chained-assignment bug of the reference.
            target_ani = 0.5 * (tr_t - lam_t)
            diff = jnp.where(sel, jnp.abs(input_ani - target_ani), 0.0)
            return jnp.sum(diff, axis=0, keepdims=True)

        # ---- pass 1: cheap mask count (always written) ----
        cnt = jnp.zeros((1, _LANES), jnp.float32)
        if n_full > 0:
            def cbody(k, acc):
                r0 = pl.multiple_of(k * _STRIP, _STRIP)
                return acc + count_strip(r0, _STRIP)
            cnt = lax.fori_loop(0, n_full, cbody, cnt)
        if rem > 0:
            cnt = cnt + count_strip(n_full * _STRIP, rem)
        cnt_ref[0, 0] = cnt
        total = jnp.sum(cnt)

        # ---- pass 2: eigen-solves only if this block has selected voxels ----
        @pl.when(total > 0.0)
        def _():
            acc = jnp.zeros((1, _LANES), jnp.float32)
            if n_full > 0:
                def body(k, a):
                    r0 = pl.multiple_of(k * _STRIP, _STRIP)
                    return a + diff_strip(r0, _STRIP)
                acc = lax.fori_loop(0, n_full, body, acc)
            if rem > 0:
                acc = acc + diff_strip(n_full * _STRIP, rem)
            sum_ref[0, 0] = acc

        @pl.when(total == 0.0)
        def _():
            sum_ref[0, 0] = jnp.zeros((1, _LANES), jnp.float32)

    return kernel


def ani_loss(input_data, target, mask, gt_mean, gt_std, tm_max=_TM_MAX):
    B, C, H, W, D = input_data.shape
    assert C == 6
    N = H * W * D                                    # voxels per (batch, channel)
    rows = -(-N // _LANES)                           # sublane rows

    def prep(x, c):
        if not jnp.issubdtype(x.dtype, jnp.floating):
            x = x.astype(jnp.float32)
        x = x.reshape(B, c, N)                       # free reshape, no transpose
        if rows * _LANES != N:
            # Minimal pad only when HWD is not lane-aligned (zeros => mask==0).
            x = jnp.pad(x, ((0, 0), (0, 0), (0, rows * _LANES - N)))
        return x.reshape(B, c, rows, _LANES)

    xf = prep(input_data, 6)
    tf = prep(target, 6)
    mf = prep(mask, 1)

    # Block-height selection: never pad rows on the host; ragged last blocks are
    # masked in-kernel.  Split B==1 into >=2 blocks so both v7x cores get work.
    if rows > tm_max:
        tm = max(8, (min(tm_max, rows) // 8) * 8)
    elif B == 1 and rows >= 2 * _STRIP:
        tm = ((-(-rows // 2)) + 7) // 8 * 8
    else:
        tm = rows                                    # block == full dim (always legal)
    tm = min(tm, rows)
    nb = -(-rows // tm)
    n_full, rem = tm // _STRIP, tm % _STRIP

    kernel = _make_kernel(tm, rows, n_full, rem)
    sums, cnts = pl.pallas_call(
        kernel,
        out_shape=(
            jax.ShapeDtypeStruct((B, nb, 1, _LANES), jnp.float32),
            jax.ShapeDtypeStruct((B, nb, 1, _LANES), jnp.float32),
        ),
        grid=(B, nb),
        in_specs=[
            pl.BlockSpec(memory_space=pltpu.MemorySpace.SMEM),            # gt_mean (6,)
            pl.BlockSpec(memory_space=pltpu.MemorySpace.SMEM),            # gt_std  (6,)
            pl.BlockSpec((1, 6, tm, _LANES), lambda b, i: (b, 0, i, 0)),  # input
            pl.BlockSpec((1, 6, tm, _LANES), lambda b, i: (b, 0, i, 0)),  # target
            pl.BlockSpec((1, 1, tm, _LANES), lambda b, i: (b, 0, i, 0)),  # mask
        ],
        out_specs=(
            pl.BlockSpec((1, 1, 1, _LANES), lambda b, i: (b, i, 0, 0)),   # sum |diff|
            pl.BlockSpec((1, 1, 1, _LANES), lambda b, i: (b, i, 0, 0)),   # count
        ),
        compiler_params=pltpu.CompilerParams(
            dimension_semantics=("parallel", "parallel"),
            vmem_limit_bytes=32 * 1024 * 1024,       # safe on v7x (64 MiB VMEM)
        ),
    )(gt_mean.astype(jnp.float32), gt_std.astype(jnp.float32), xf, tf, mf)

    # F.l1_loss(reduction='mean') over the mask==1 voxels (NaN if none, as in ref).
    return jnp.sum(sums) / jnp.sum(cnts)


def ani_loss_reference(input_data, target, mask, gt_mean, gt_std):
    """Pure-JAX reference (eigvalsh), faithful to the PyTorch module."""
    std = gt_std.reshape(1, 6, 1, 1, 1).astype(jnp.float32)
    mean = gt_mean.reshape(1, 6, 1, 1, 1).astype(jnp.float32)
    new_in = (input_data.astype(jnp.float32) * std + mean) * mask
    new_tg = (target.astype(jnp.float32) * std + mean) * mask

    def to_mat(t):
        xx, xy, xz, yy, yz, zz = [t[:, c] for c in range(6)]
        r0 = jnp.stack([xx, xy, xz], axis=-1)
        r1 = jnp.stack([xy, yy, yz], axis=-1)
        r2 = jnp.stack([xz, yz, zz], axis=-1)
        return jnp.stack([r0, r1, r2], axis=-2)      # (B, H, W, D, 3, 3)

    ei = jnp.linalg.eigvalsh(to_mat(new_in))         # ascending
    et = jnp.linalg.eigvalsh(to_mat(new_tg))
    in_ani = ei[..., 2] - 0.5 * (ei[..., 0] + ei[..., 1])
    tg_ani = 0.5 * (et[..., 0] + et[..., 1])         # chained-assignment bug reproduced
    sel = (mask[:, 0] == 1.0)
    diff = jnp.abs(in_ani - tg_ani)
    return jnp.sum(jnp.where(sel, diff, 0.0)) / jnp.sum(sel.astype(jnp.float32))


if __name__ == "__main__":
    key = jax.random.PRNGKey(0)
    B, H, W, D = 2, 6, 16, 16                        # 1536 voxels/batch, 6 tensor channels
    k1, k2, k3 = jax.random.split(key, 3)
    input_data = jax.random.normal(k1, (B, 6, H, W, D), dtype=jnp.float32)
    target = jax.random.normal(k2, (B, 6, H, W, D), dtype=jnp.float32)
    mask = (jax.random.uniform(k3, (B, 1, H, W, D)) > 0.3).astype(jnp.float32)

    # Deterministic surrogate for 'train_gt_mean.npy' (shape (6,)); the original
    # module loads the SAME file for both mean and std, so gt_std == gt_mean.
    gt_mean = jnp.linspace(0.5, 1.5, 6, dtype=jnp.float32)
    gt_std = gt_mean

    loss = ani_loss(input_data, target, mask, gt_mean, gt_std)                   # single block
    loss_tiled = ani_loss(input_data, target, mask, gt_mean, gt_std, tm_max=8)   # ragged multi-block
    mask_skip = mask.at[0].set(0.0)                  # batch 0 fully masked -> empty-block skip path
    loss_skip = ani_loss(input_data, target, mask_skip, gt_mean, gt_std)
    jax.block_until_ready((loss, loss_tiled, loss_skip))

    ref = ani_loss_reference(input_data, target, mask, gt_mean, gt_std)
    ref_skip = ani_loss_reference(input_data, target, mask_skip, gt_mean, gt_std)

    def close(a, b, tol=1e-3):
        return abs(float(a) - float(b)) < tol * max(1.0, abs(float(b)))

    assert close(loss, ref), (float(loss), float(ref))
    assert close(loss_tiled, ref), (float(loss_tiled), float(ref))
    assert close(loss_skip, ref_skip), (float(loss_skip), float(ref_skip))
    print("KERNEL_OK")
</pallas_src>

<mosaic_0001>
module attributes {stable_mosaic.version = 11 : i64} {
  func.func @kernel(%arg0: i32, %arg1: i32, %arg2: memref<6xf32, #tpu.memory_space<smem>>, %arg3: memref<6xf32, #tpu.memory_space<smem>>, %arg4: memref<1x6x12x128xf32, #tpu.memory_space<vmem>>, %arg5: memref<1x6x12x128xf32, #tpu.memory_space<vmem>>, %arg6: memref<1x1x12x128xf32, #tpu.memory_space<vmem>>, %arg7: memref<1x1x1x128xf32, #tpu.memory_space<vmem>>, %arg8: memref<1x1x1x128xf32, #tpu.memory_space<vmem>>) attributes {dimension_semantics = [#tpu.dimension_semantics<parallel>, #tpu.dimension_semantics<parallel>], iteration_bounds = array<i64: 2, 1>, scalar_prefetch = 0 : i64, scratch_operands = 0 : i64, tpu.core_type = #tpu.core_type<tc>, window_params = [{transform_indices = @transform_0, window_bounds = array<i64: 6>}, {transform_indices = @transform_1, window_bounds = array<i64: 6>}, {transform_indices = @transform_2, window_bounds = array<i64: 1, 6, 12, 128>}, {transform_indices = @transform_3, window_bounds = array<i64: 1, 6, 12, 128>}, {transform_indices = @transform_4, window_bounds = array<i64: 1, 1, 12, 128>}, {transform_indices = @transform_5, window_bounds = array<i64: 1, 1, 1, 128>}, {transform_indices = @transform_6, window_bounds = array<i64: 1, 1, 1, 128>}]} {
    %c12_i32 = arith.constant 12 : i32
    %0 = arith.muli %arg1, %c12_i32 : i32
    %c0 = arith.constant 0 : index
    %1 = memref.load %arg2[%c0] : memref<6xf32, #tpu.memory_space<smem>>
    %c1 = arith.constant 1 : index
    %2 = memref.load %arg2[%c1] : memref<6xf32, #tpu.memory_space<smem>>
    %c2 = arith.constant 2 : index
    %3 = memref.load %arg2[%c2] : memref<6xf32, #tpu.memory_space<smem>>
    %c3 = arith.constant 3 : index
    %4 = memref.load %arg2[%c3] : memref<6xf32, #tpu.memory_space<smem>>
    %c4 = arith.constant 4 : index
    %5 = memref.load %arg2[%c4] : memref<6xf32, #tpu.memory_space<smem>>
    %c5 = arith.constant 5 : index
    %6 = memref.load %arg2[%c5] : memref<6xf32, #tpu.memory_space<smem>>
    %c0_0 = arith.constant 0 : index
    %7 = memref.load %arg3[%c0_0] : memref<6xf32, #tpu.memory_space<smem>>
    %c1_1 = arith.constant 1 : index
    %8 = memref.load %arg3[%c1_1] : memref<6xf32, #tpu.memory_space<smem>>
    %c2_2 = arith.constant 2 : index
    %9 = memref.load %arg3[%c2_2] : memref<6xf32, #tpu.memory_space<smem>>
    %c3_3 = arith.constant 3 : index
    %10 = memref.load %arg3[%c3_3] : memref<6xf32, #tpu.memory_space<smem>>
    %c4_4 = arith.constant 4 : index
    %11 = memref.load %arg3[%c4_4] : memref<6xf32, #tpu.memory_space<smem>>
    %c5_5 = arith.constant 5 : index
    %12 = memref.load %arg3[%c5_5] : memref<6xf32, #tpu.memory_space<smem>>
    %cst = arith.constant 0.000000e+00 : f32
    %13 = vector.broadcast %cst : f32 to vector<1x128xf32>
    %c0_6 = arith.constant 0 : index
    %c0_7 = arith.constant 0 : index
    %c0_8 = arith.constant 0 : index
    %c0_9 = arith.constant 0 : index
    %14 = vector.load %arg6[%c0_6, %c0_7, %c0_8, %c0_9] : memref<1x1x12x128xf32, #tpu.memory_space<vmem>>, vector<1x1x12x128xf32>
    %15 = vector.shape_cast %14 : vector<1x1x12x128xf32> to vector<12x128xf32>
    %c0_i32 = arith.constant 0 : i32
    %16 = arith.addi %0, %c0_i32 : i32
    %17 = tpu.iota {dimensions = array<i32: 0>} : vector<12x128xi32>
    %18 = vector.broadcast %16 : i32 to vector<12x128xi32>
    %19 = arith.addi %18, %17 : vector<12x128xi32>
    %cst_10 = arith.constant 1.000000e+00 : f32
    %20 = vector.broadcast %cst_10 : f32 to vector<12x128xf32>
    %21 = arith.cmpf oeq, %15, %20 : vector<12x128xf32>
    %c12_i32_11 = arith.constant 12 : i32
    %22 = vector.broadcast %c12_i32_11 : i32 to vector<12x128xi32>
    %23 = arith.cmpi slt, %19, %22 : vector<12x128xi32>
    %24 = arith.andi %21, %23 : vector<12x128xi1>
    %cst_12 = arith.constant 1.000000e+00 : f32
    %cst_13 = arith.constant 0.000000e+00 : f32
    %25 = vector.broadcast %cst_12 : f32 to vector<12x128xf32>
    %26 = vector.broadcast %cst_13 : f32 to vector<12x128xf32>
    %27 = arith.select %24, %25, %26 : vector<12x128xi1>, vector<12x128xf32>
    %cst_14 = arith.constant dense<0.000000e+00> : vector<128xf32>
    %28 = vector.multi_reduction <add>, %27, %cst_14 [0] : vector<12x128xf32> to vector<128xf32>
    %29 = vector.shape_cast %28 : vector<128xf32> to vector<1x128xf32>
    %30 = arith.addf %13, %29 : vector<1x128xf32>
    %c0_15 = arith.constant 0 : index
    %c0_16 = arith.constant 0 : index
    %c0_17 = arith.constant 0 : index
    %c0_18 = arith.constant 0 : index
    %31 = vector.load %arg8[%c0_15, %c0_16, %c0_17, %c0_18] : memref<1x1x1x128xf32, #tpu.memory_space<vmem>>, vector<1x1x1x128xf32>
    %32 = vector.shape_cast %31 : vector<1x1x1x128xf32> to vector<1x128xf32>
    %33 = vector.shape_cast %30 : vector<1x128xf32> to vector<1x1x1x128xf32>
    tpu.vector_store %arg8[%c0_15, %c0_16, %c0_17, %c0_18], %33 {strides = array<i32>} : memref<1x1x1x128xf32, #tpu.memory_space<vmem>>, vector<1x1x1x128xf32>,
    %34 = vector.shape_cast %30 : vector<1x128xf32> to vector<1x1x128xf32>
    %cst_19 = arith.constant dense<0.000000e+00> : vector<1xf32>
    %35 = vector.multi_reduction <add>, %34, %cst_19 [1, 2] : vector<1x1x128xf32> to vector<1xf32>
    %36 = vector.shape_cast %35 : vector<1xf32> to vector<1x1x1xf32>
    %37 = vector.extract %36[0, 0, 0] : f32 from vector<1x1x1xf32>
    %cst_20 = arith.constant 0.000000e+00 : f32
    %38 = arith.cmpf ogt, %37, %cst_20 : f32
    %39 = arith.extui %38 : i1 to i32
    %c0_i32_21 = arith.constant 0 : i32
    %40 = arith.cmpi ne, %39, %c0_i32_21 : i32
    scf.if %40 {
      %cst_24 = arith.constant 0.000000e+00 : f32
      %44 = vector.broadcast %cst_24 : f32 to vector<1x128xf32>
      %c0_25 = arith.constant 0 : index
      %c0_26 = arith.constant 0 : index
      %c0_27 = arith.constant 0 : index
      %c0_28 = arith.constant 0 : index
      %45 = vector.load %arg6[%c0_25, %c0_26, %c0_27, %c0_28] : memref<1x1x12x128xf32, #tpu.memory_space<vmem>>, vector<1x1x12x128xf32>
      %46 = vector.shape_cast %45 : vector<1x1x12x128xf32> to vector<12x128xf32>
      %c0_i32_29 = arith.constant 0 : i32
      %47 = arith.addi %0, %c0_i32_29 : i32
      %48 = tpu.iota {dimensions = array<i32: 0>} : vector<12x128xi32>
      %49 = vector.broadcast %47 : i32 to vector<12x128xi32>
      %50 = arith.addi %49, %48 : vector<12x128xi32>
      %cst_30 = arith.constant 1.000000e+00 : f32
      %51 = vector.broadcast %cst_30 : f32 to vector<12x128xf32>
      %52 = arith.cmpf oeq, %46, %51 : vector<12x128xf32>
      %c12_i32_31 = arith.constant 12 : i32
      %53 = vector.broadcast %c12_i32_31 : i32 to vector<12x128xi32>
      %54 = arith.cmpi slt, %50, %53 : vector<12x128xi32>
      %55 = arith.andi %52, %54 : vector<12x128xi1>
      %c0_32 = arith.constant 0 : index
      %c0_33 = arith.constant 0 : index
      %c0_34 = arith.constant 0 : index
      %c0_35 = arith.constant 0 : index
      %56 = vector.load %arg4[%c0_32, %c0_33, %c0_34, %c0_35] : memref<1x6x12x128xf32, #tpu.memory_space<vmem>>, vector<1x1x12x128xf32>
      %57 = vector.shape_cast %56 : vector<1x1x12x128xf32> to vector<12x128xf32>
      %58 = vector.broadcast %7 : f32 to vector<12x128xf32>
      %59 = arith.mulf %57, %58 : vector<12x128xf32>
      %60 = vector.broadcast %1 : f32 to vector<12x128xf32>
      %61 = arith.addf %59, %60 : vector<12x128xf32>
      %c0_36 = arith.constant 0 : index
      %c1_37 = arith.constant 1 : index
      %c0_38 = arith.constant 0 : index
      %c0_39 = arith.constant 0 : index
      %62 = vector.load %arg4[%c0_36, %c1_37, %c0_38, %c0_39] : memref<1x6x12x128xf32, #tpu.memory_space<vmem>>, vector<1x1x12x128xf32>
      %63 = vector.shape_cast %62 : vector<1x1x12x128xf32> to vector<12x128xf32>
      %64 = vector.broadcast %8 : f32 to vector<12x128xf32>
      %65 = arith.mulf %63, %64 : vector<12x128xf32>
      %66 = vector.broadcast %2 : f32 to vector<12x128xf32>
      %67 = arith.addf %65, %66 : vector<12x128xf32>
      %c0_40 = arith.constant 0 : index
      %c2_41 = arith.constant 2 : index
      %c0_42 = arith.constant 0 : index
      %c0_43 = arith.constant 0 : index
      %68 = vector.load %arg4[%c0_40, %c2_41, %c0_42, %c0_43] : memref<1x6x12x128xf32, #tpu.memory_space<vmem>>, vector<1x1x12x128xf32>
      %69 = vector.shape_cast %68 : vector<1x1x12x128xf32> to vector<12x128xf32>
      %70 = vector.broadcast %9 : f32 to vector<12x128xf32>
      %71 = arith.mulf %69, %70 : vector<12x128xf32>
      %72 = vector.broadcast %3 : f32 to vector<12x128xf32>
      %73 = arith.addf %71, %72 : vector<12x128xf32>
      %c0_44 = arith.constant 0 : index
      %c3_45 = arith.constant 3 : index
      %c0_46 = arith.constant 0 : index
      %c0_47 = arith.constant 0 : index
      %74 = vector.load %arg4[%c0_44, %c3_45, %c0_46, %c0_47] : memref<1x6x12x128xf32, #tpu.memory_space<vmem>>, vector<1x1x12x128xf32>
      %75 = vector.shape_cast %74 : vector<1x1x12x128xf32> to vector<12x128xf32>
      %76 = vector.broadcast %10 : f32 to vector<12x128xf32>
      %77 = arith.mulf %75, %76 : vector<12x128xf32>
      %78 = vector.broadcast %4 : f32 to vector<12x128xf32>
      %79 = arith.addf %77, %78 : vector<12x128xf32>
      %c0_48 = arith.constant 0 : index
      %c4_49 = arith.constant 4 : index
      %c0_50 = arith.constant 0 : index
      %c0_51 = arith.constant 0 : index
      %80 = vector.load %arg4[%c0_48, %c4_49, %c0_50, %c0_51] : memref<1x6x12x128xf32, #tpu.memory_space<vmem>>, vector<1x1x12x128xf32>
      %81 = vector.shape_cast %80 : vector<1x1x12x128xf32> to vector<12x128xf32>
      %82 = vector.broadcast %11 : f32 to vector<12x128xf32>
      %83 = arith.mulf %81, %82 : vector<12x128xf32>
      %84 = vector.broadcast %5 : f32 to vector<12x128xf32>
      %85 = arith.addf %83, %84 : vector<12x128xf32>
      %c0_52 = arith.constant 0 : index
      %c5_53 = arith.constant 5 : index
      %c0_54 = arith.constant 0 : index
      %c0_55 = arith.constant 0 : index
      %86 = vector.load %arg4[%c0_52, %c5_53, %c0_54, %c0_55] : memref<1x6x12x128xf32, #tpu.memory_space<vmem>>, vector<1x1x12x128xf32>
      %87 = vector.shape_cast %86 : vector<1x1x12x128xf32> to vector<12x128xf32>
      %88 = vector.broadcast %12 : f32 to vector<12x128xf32>
      %89 = arith.mulf %87, %88 : vector<12x128xf32>
      %90 = vector.broadcast %6 : f32 to vector<12x128xf32>
      %91 = arith.addf %89, %90 : vector<12x128xf32>
      %92 = arith.addf %61, %79 : vector<12x128xf32>
      %93 = arith.addf %92, %91 : vector<12x128xf32>
      %cst_56 = arith.constant 0.333333343 : f32
      %94 = vector.broadcast %cst_56 : f32 to vector<12x128xf32>
      %95 = arith.mulf %93, %94 : vector<12x128xf32>
      %96 = arith.subf %61, %95 : vector<12x128xf32>
      %97 = arith.subf %79, %95 : vector<12x128xf32>
      %98 = arith.subf %91, %95 : vector<12x128xf32>
      %99 = arith.mulf %67, %67 : vector<12x128xf32>
      %100 = arith.mulf %73, %73 : vector<12x128xf32>
      %101 = arith.addf %99, %100 : vector<12x128xf32>
      %102 = arith.mulf %85, %85 : vector<12x128xf32>
      %103 = arith.addf %101, %102 : vector<12x128xf32>
      %104 = arith.mulf %96, %96 : vector<12x128xf32>
      %105 = arith.mulf %97, %97 : vector<12x128xf32>
      %106 = arith.addf %104, %105 : vector<12x128xf32>
      %107 = arith.mulf %98, %98 : vector<12x128xf32>
      %108 = arith.addf %106, %107 : vector<12x128xf32>
      %cst_57 = arith.constant 2.000000e+00 : f32
      %109 = vector.broadcast %cst_57 : f32 to vector<12x128xf32>
      %110 = arith.mulf %109, %103 : vector<12x128xf32>
      %111 = arith.addf %108, %110 : vector<12x128xf32>
      %cst_58 = arith.constant 9.99999968E-21 : f32
      %112 = vector.broadcast %cst_58 : f32 to vector<12x128xf32>
      %113 = arith.maximumf %111, %112 : vector<12x128xf32>
      %cst_59 = arith.constant 0.166666672 : f32
      %114 = vector.broadcast %cst_59 : f32 to vector<12x128xf32>
      %115 = arith.mulf %113, %114 : vector<12x128xf32>
      %116 = math.rsqrt %115 : vector<12x128xf32>
      %117 = arith.mulf %115, %116 : vector<12x128xf32>
      %118 = arith.mulf %97, %98 : vector<12x128xf32>
      %119 = arith.mulf %85, %85 : vector<12x128xf32>
      %120 = arith.subf %118, %119 : vector<12x128xf32>
      %121 = arith.mulf %96, %120 : vector<12x128xf32>
      %122 = arith.mulf %67, %98 : vector<12x128xf32>
      %123 = arith.mulf %85, %73 : vector<12x128xf32>
      %124 = arith.subf %122, %123 : vector<12x128xf32>
      %125 = arith.mulf %67, %124 : vector<12x128xf32>
      %126 = arith.subf %121, %125 : vector<12x128xf32>
      %127 = arith.mulf %67, %85 : vector<12x128xf32>
      %128 = arith.mulf %97, %73 : vector<12x128xf32>
      %129 = arith.subf %127, %128 : vector<12x128xf32>
      %130 = arith.mulf %73, %129 : vector<12x128xf32>
      %131 = arith.addf %126, %130 : vector<12x128xf32>
      %cst_60 = arith.constant 5.000000e-01 : f32
      %132 = vector.broadcast %cst_60 : f32 to vector<12x128xf32>
      %133 = arith.mulf %131, %132 : vector<12x128xf32>
      %134 = arith.mulf %116, %116 : vector<12x128xf32>
      %135 = arith.mulf %133, %134 : vector<12x128xf32>
      %136 = arith.mulf %135, %116 : vector<12x128xf32>
      %cst_61 = arith.constant -1.000000e+00 : f32
      %cst_62 = arith.constant 1.000000e+00 : f32
      %137 = vector.broadcast %cst_61 : f32 to vector<12x128xf32>
      %138 = arith.maximumf %137, %136 : vector<12x128xf32>
      %139 = vector.broadcast %cst_62 : f32 to vector<12x128xf32>
      %140 = arith.minimumf %139, %138 : vector<12x128xf32>
      %cst_63 = arith.constant 1.000000e+00 : f32
      %141 = vector.broadcast %cst_63 : f32 to vector<12x128xf32>
      %142 = arith.addf %140, %141 : vector<12x128xf32>
      %cst_64 = arith.constant 5.000000e-01 : f32
      %143 = vector.broadcast %cst_64 : f32 to vector<12x128xf32>
      %144 = arith.mulf %143, %142 : vector<12x128xf32>
      %cst_65 = arith.constant 0.000000e+00 : f32
      %145 = vector.broadcast %cst_65 : f32 to vector<12x128xf32>
      %146 = arith.maximumf %144, %145 : vector<12x128xf32>
      %147 = math.sqrt %146 : vector<12x128xf32>
      %cst_66 = arith.constant 0.022868298 : f32
      %148 = vector.broadcast %cst_66 : f32 to vector<12x128xf32>
      %149 = arith.mulf %147, %148 : vector<12x128xf32>
      %cst_67 = arith.constant -0.0329218097 : f32
      %150 = vector.broadcast %cst_67 : f32 to vector<12x128xf32>
      %151 = arith.addf %150, %149 : vector<12x128xf32>
      %152 = arith.mulf %147, %151 : vector<12x128xf32>
      %cst_68 = arith.constant 0.0534583591 : f32
      %153 = vector.broadcast %cst_68 : f32 to vector<12x128xf32>
      %154 = arith.addf %153, %152 : vector<12x128xf32>
      %155 = arith.mulf %147, %154 : vector<12x128xf32>
      %cst_69 = arith.constant -0.111111112 : f32
      %156 = vector.broadcast %cst_69 : f32 to vector<12x128xf32>
      %157 = arith.addf %156, %155 : vector<12x128xf32>
      %158 = arith.mulf %147, %157 : vector<12x128xf32>
      %cst_70 = arith.constant 0.577350259 : f32
      %159 = vector.broadcast %cst_70 : f32 to vector<12x128xf32>
      %160 = arith.addf %159, %158 : vector<12x128xf32>
      %161 = arith.mulf %147, %160 : vector<12x128xf32>
      %cst_71 = arith.constant 5.000000e-01 : f32
      %162 = vector.broadcast %cst_71 : f32 to vector<12x128xf32>
      %163 = arith.addf %162, %161 : vector<12x128xf32>
      %164 = arith.mulf %163, %163 : vector<12x128xf32>
      %cst_72 = arith.constant 4.000000e+00 : f32
      %165 = vector.broadcast %cst_72 : f32 to vector<12x128xf32>
      %166 = arith.mulf %165, %164 : vector<12x128xf32>
      %cst_73 = arith.constant 3.000000e+00 : f32
      %167 = vector.broadcast %cst_73 : f32 to vector<12x128xf32>
      %168 = arith.subf %166, %167 : vector<12x128xf32>
      %169 = arith.mulf %168, %163 : vector<12x128xf32>
      %170 = arith.subf %169, %140 : vector<12x128xf32>
      %cst_74 = arith.constant 1.200000e+01 : f32
      %171 = vector.broadcast %cst_74 : f32 to vector<12x128xf32>
      %172 = arith.mulf %171, %164 : vector<12x128xf32>
      %cst_75 = arith.constant 3.000000e+00 : f32
      %173 = vector.broadcast %cst_75 : f32 to vector<12x128xf32>
      %174 = arith.subf %172, %173 : vector<12x128xf32>
      %cst_76 = arith.constant 0.00999999977 : f32
      %175 = vector.broadcast %cst_76 : f32 to vector<12x128xf32>
      %176 = arith.maximumf %174, %175 : vector<12x128xf32>
      %177 = tpu.reciprocal %176 {approx = true} : vector<12x128xf32> -> vector<12x128xf32>
      %178 = arith.mulf %170, %177 : vector<12x128xf32>
      %179 = arith.subf %163, %178 : vector<12x128xf32>
      %180 = arith.mulf %179, %179 : vector<12x128xf32>
      %cst_77 = arith.constant 4.000000e+00 : f32
      %181 = vector.broadcast %cst_77 : f32 to vector<12x128xf32>
      %182 = arith.mulf %181, %180 : vector<12x128xf32>
      %cst_78 = arith.constant 3.000000e+00 : f32
      %183 = vector.broadcast %cst_78 : f32 to vector<12x128xf32>
      %184 = arith.subf %182, %183 : vector<12x128xf32>
      %185 = arith.mulf %184, %179 : vector<12x128xf32>
      %186 = arith.subf %185, %140 : vector<12x128xf32>
      %cst_79 = arith.constant 1.200000e+01 : f32
      %187 = vector.broadcast %cst_79 : f32 to vector<12x128xf32>
      %188 = arith.mulf %187, %180 : vector<12x128xf32>
      %cst_80 = arith.constant 3.000000e+00 : f32
      %189 = vector.broadcast %cst_80 : f32 to vector<12x128xf32>
      %190 = arith.subf %188, %189 : vector<12x128xf32>
      %cst_81 = arith.constant 0.00999999977 : f32
      %191 = vector.broadcast %cst_81 : f32 to vector<12x128xf32>
      %192 = arith.maximumf %190, %191 : vector<12x128xf32>
      %193 = tpu.reciprocal %192 {approx = true} : vector<12x128xf32> -> vector<12x128xf32>
      %194 = arith.mulf %186, %193 : vector<12x128xf32>
      %195 = arith.subf %179, %194 : vector<12x128xf32>
      %cst_82 = arith.constant 5.000000e-01 : f32
      %cst_83 = arith.constant 1.000000e+00 : f32
      %196 = vector.broadcast %cst_82 : f32 to vector<12x128xf32>
      %197 = arith.maximumf %196, %195 : vector<12x128xf32>
      %198 = vector.broadcast %cst_83 : f32 to vector<12x128xf32>
      %199 = arith.minimumf %198, %197 : vector<12x128xf32>
      %cst_84 = arith.constant 2.000000e+00 : f32
      %200 = vector.broadcast %cst_84 : f32 to vector<12x128xf32>
      %201 = arith.mulf %200, %117 : vector<12x128xf32>
      %202 = arith.mulf %201, %199 : vector<12x128xf32>
      %203 = arith.addf %95, %202 : vector<12x128xf32>
      %cst_85 = arith.constant 9.99999996E-13 : f32
      %204 = vector.broadcast %cst_85 : f32 to vector<12x128xf32>
      %205 = arith.cmpf ogt, %111, %204 : vector<12x128xf32>
      %206 = arith.select %205, %203, %95 : vector<12x128xi1>, vector<12x128xf32>
      %cst_86 = arith.constant 1.500000e+00 : f32
      %207 = vector.broadcast %cst_86 : f32 to vector<12x128xf32>
      %208 = arith.mulf %207, %206 : vector<12x128xf32>
      %cst_87 = arith.constant 5.000000e-01 : f32
      %209 = vector.broadcast %cst_87 : f32 to vector<12x128xf32>
      %210 = arith.mulf %209, %93 : vector<12x128xf32>
      %211 = arith.subf %208, %210 : vector<12x128xf32>
      %c0_88 = arith.constant 0 : index
      %c0_89 = arith.constant 0 : index
      %c0_90 = arith.constant 0 : index
      %c0_91 = arith.constant 0 : index
      %212 = vector.load %arg5[%c0_88, %c0_89, %c0_90, %c0_91] : memref<1x6x12x128xf32, #tpu.memory_space<vmem>>, vector<1x1x12x128xf32>
      %213 = vector.shape_cast %212 : vector<1x1x12x128xf32> to vector<12x128xf32>
      %214 = vector.broadcast %7 : f32 to vector<12x128xf32>
      %215 = arith.mulf %213, %214 : vector<12x128xf32>
      %216 = vector.broadcast %1 : f32 to vector<12x128xf32>
      %217 = arith.addf %215, %216 : vector<12x128xf32>
      %c0_92 = arith.constant 0 : index
      %c1_93 = arith.constant 1 : index
      %c0_94 = arith.constant 0 : index
      %c0_95 = arith.constant 0 : index
      %218 = vector.load %arg5[%c0_92, %c1_93, %c0_94, %c0_95] : memref<1x6x12x128xf32, #tpu.memory_space<vmem>>, vector<1x1x12x128xf32>
      %219 = vector.shape_cast %218 : vector<1x1x12x128xf32> to vector<12x128xf32>
      %220 = vector.broadcast %8 : f32 to vector<12x128xf32>
      %221 = arith.mulf %219, %220 : vector<12x128xf32>
      %222 = vector.broadcast %2 : f32 to vector<12x128xf32>
      %223 = arith.addf %221, %222 : vector<12x128xf32>
      %c0_96 = arith.constant 0 : index
      %c2_97 = arith.constant 2 : index
      %c0_98 = arith.constant 0 : index
      %c0_99 = arith.constant 0 : index
      %224 = vector.load %arg5[%c0_96, %c2_97, %c0_98, %c0_99] : memref<1x6x12x128xf32, #tpu.memory_space<vmem>>, vector<1x1x12x128xf32>
      %225 = vector.shape_cast %224 : vector<1x1x12x128xf32> to vector<12x128xf32>
      %226 = vector.broadcast %9 : f32 to vector<12x128xf32>
      %227 = arith.mulf %225, %226 : vector<12x128xf32>
      %228 = vector.broadcast %3 : f32 to vector<12x128xf32>
      %229 = arith.addf %227, %228 : vector<12x128xf32>
      %c0_100 = arith.constant 0 : index
      %c3_101 = arith.constant 3 : index
      %c0_102 = arith.constant 0 : index
      %c0_103 = arith.constant 0 : index
      %230 = vector.load %arg5[%c0_100, %c3_101, %c0_102, %c0_103] : memref<1x6x12x128xf32, #tpu.memory_space<vmem>>, vector<1x1x12x128xf32>
      %231 = vector.shape_cast %230 : vector<1x1x12x128xf32> to vector<12x128xf32>
      %232 = vector.broadcast %10 : f32 to vector<12x128xf32>
      %233 = arith.mulf %231, %232 : vector<12x128xf32>
      %234 = vector.broadcast %4 : f32 to vector<12x128xf32>
      %235 = arith.addf %233, %234 : vector<12x128xf32>
      %c0_104 = arith.constant 0 : index
      %c4_105 = arith.constant 4 : index
      %c0_106 = arith.constant 0 : index
      %c0_107 = arith.constant 0 : index
      %236 = vector.load %arg5[%c0_104, %c4_105, %c0_106, %c0_107] : memref<1x6x12x128xf32, #tpu.memory_space<vmem>>, vector<1x1x12x128xf32>
      %237 = vector.shape_cast %236 : vector<1x1x12x128xf32> to vector<12x128xf32>
      %238 = vector.broadcast %11 : f32 to vector<12x128xf32>
      %239 = arith.mulf %237, %238 : vector<12x128xf32>
      %240 = vector.broadcast %5 : f32 to vector<12x128xf32>
      %241 = arith.addf %239, %240 : vector<12x128xf32>
      %c0_108 = arith.constant 0 : index
      %c5_109 = arith.constant 5 : index
      %c0_110 = arith.constant 0 : index
      %c0_111 = arith.constant 0 : index
      %242 = vector.load %arg5[%c0_108, %c5_109, %c0_110, %c0_111] : memref<1x6x12x128xf32, #tpu.memory_space<vmem>>, vector<1x1x12x128xf32>
      %243 = vector.shape_cast %242 : vector<1x1x12x128xf32> to vector<12x128xf32>
      %244 = vector.broadcast %12 : f32 to vector<12x128xf32>
      %245 = arith.mulf %243, %244 : vector<12x128xf32>
      %246 = vector.broadcast %6 : f32 to vector<12x128xf32>
      %247 = arith.addf %245, %246 : vector<12x128xf32>
      %248 = arith.addf %217, %235 : vector<12x128xf32>
      %249 = arith.addf %248, %247 : vector<12x128xf32>
      %cst_112 = arith.constant 0.333333343 : f32
      %250 = vector.broadcast %cst_112 : f32 to vector<12x128xf32>
      %251 = arith.mulf %249, %250 : vector<12x128xf32>
      %252 = arith.subf %217, %251 : vector<12x128xf32>
      %253 = arith.subf %235, %251 : vector<12x128xf32>
      %254 = arith.subf %247, %251 : vector<12x128xf32>
      %255 = arith.mulf %223, %223 : vector<12x128xf32>
      %256 = arith.mulf %229, %229 : vector<12x128xf32>
      %257 = arith.addf %255, %256 : vector<12x128xf32>
      %258 = arith.mulf %241, %241 : vector<12x128xf32>
      %259 = arith.addf %257, %258 : vector<12x128xf32>
      %260 = arith.mulf %252, %252 : vector<12x128xf32>
      %261 = arith.mulf %253, %253 : vector<12x128xf32>
      %262 = arith.addf %260, %261 : vector<12x128xf32>
      %263 = arith.mulf %254, %254 : vector<12x128xf32>
      %264 = arith.addf %262, %263 : vector<12x128xf32>
      %cst_113 = arith.constant 2.000000e+00 : f32
      %265 = vector.broadcast %cst_113 : f32 to vector<12x128xf32>
      %266 = arith.mulf %265, %259 : vector<12x128xf32>
      %267 = arith.addf %264, %266 : vector<12x128xf32>
      %cst_114 = arith.constant 9.99999968E-21 : f32
      %268 = vector.broadcast %cst_114 : f32 to vector<12x128xf32>
      %269 = arith.maximumf %267, %268 : vector<12x128xf32>
      %cst_115 = arith.constant 0.166666672 : f32
      %270 = vector.broadcast %cst_115 : f32 to vector<12x128xf32>
      %271 = arith.mulf %269, %270 : vector<12x128xf32>
      %272 = math.rsqrt %271 : vector<12x128xf32>
      %273 = arith.mulf %271, %272 : vector<12x128xf32>
      %274 = arith.mulf %253, %254 : vector<12x128xf32>
      %275 = arith.mulf %241, %241 : vector<12x128xf32>
      %276 = arith.subf %274, %275 : vector<12x128xf32>
      %277 = arith.mulf %252, %276 : vector<12x128xf32>
      %278 = arith.mulf %223, %254 : vector<12x128xf32>
      %279 = arith.mulf %241, %229 : vector<12x128xf32>
      %280 = arith.subf %278, %279 : vector<12x128xf32>
      %281 = arith.mulf %223, %280 : vector<12x128xf32>
      %282 = arith.subf %277, %281 : vector<12x128xf32>
      %283 = arith.mulf %223, %241 : vector<12x128xf32>
      %284 = arith.mulf %253, %229 : vector<12x128xf32>
      %285 = arith.subf %283, %284 : vector<12x128xf32>
      %286 = arith.mulf %229, %285 : vector<12x128xf32>
      %287 = arith.addf %282, %286 : vector<12x128xf32>
      %cst_116 = arith.constant 5.000000e-01 : f32
      %288 = vector.broadcast %cst_116 : f32 to vector<12x128xf32>
      %289 = arith.mulf %287, %288 : vector<12x128xf32>
      %290 = arith.mulf %272, %272 : vector<12x128xf32>
      %291 = arith.mulf %289, %290 : vector<12x128xf32>
      %292 = arith.mulf %291, %272 : vector<12x128xf32>
      %cst_117 = arith.constant -1.000000e+00 : f32
      %cst_118 = arith.constant 1.000000e+00 : f32
      %293 = vector.broadcast %cst_117 : f32 to vector<12x128xf32>
      %294 = arith.maximumf %293, %292 : vector<12x128xf32>
      %295 = vector.broadcast %cst_118 : f32 to vector<12x128xf32>
      %296 = arith.minimumf %295, %294 : vector<12x128xf32>
      %cst_119 = arith.constant 1.000000e+00 : f32
      %297 = vector.broadcast %cst_119 : f32 to vector<12x128xf32>
      %298 = arith.addf %296, %297 : vector<12x128xf32>
      %cst_120 = arith.constant 5.000000e-01 : f32
      %299 = vector.broadcast %cst_120 : f32 to vector<12x128xf32>
      %300 = arith.mulf %299, %298 : vector<12x128xf32>
      %cst_121 = arith.constant 0.000000e+00 : f32
      %301 = vector.broadcast %cst_121 : f32 to vector<12x128xf32>
      %302 = arith.maximumf %300, %301 : vector<12x128xf32>
      %303 = math.sqrt %302 : vector<12x128xf32>
      %cst_122 = arith.constant 0.022868298 : f32
      %304 = vector.broadcast %cst_122 : f32 to vector<12x128xf32>
      %305 = arith.mulf %303, %304 : vector<12x128xf32>
      %cst_123 = arith.constant -0.0329218097 : f32
      %306 = vector.broadcast %cst_123 : f32 to vector<12x128xf32>
      %307 = arith.addf %306, %305 : vector<12x128xf32>
      %308 = arith.mulf %303, %307 : vector<12x128xf32>
      %cst_124 = arith.constant 0.0534583591 : f32
      %309 = vector.broadcast %cst_124 : f32 to vector<12x128xf32>
      %310 = arith.addf %309, %308 : vector<12x128xf32>
      %311 = arith.mulf %303, %310 : vector<12x128xf32>
      %cst_125 = arith.constant -0.111111112 : f32
      %312 = vector.broadcast %cst_125 : f32 to vector<12x128xf32>
      %313 = arith.addf %312, %311 : vector<12x128xf32>
      %314 = arith.mulf %303, %313 : vector<12x128xf32>
      %cst_126 = arith.constant 0.577350259 : f32
      %315 = vector.broadcast %cst_126 : f32 to vector<12x128xf32>
      %316 = arith.addf %315, %314 : vector<12x128xf32>
      %317 = arith.mulf %303, %316 : vector<12x128xf32>
      %cst_127 = arith.constant 5.000000e-01 : f32
      %318 = vector.broadcast %cst_127 : f32 to vector<12x128xf32>
      %319 = arith.addf %318, %317 : vector<12x128xf32>
      %320 = arith.mulf %319, %319 : vector<12x128xf32>
      %cst_128 = arith.constant 4.000000e+00 : f32
      %321 = vector.broadcast %cst_128 : f32 to vector<12x128xf32>
      %322 = arith.mulf %321, %320 : vector<12x128xf32>
      %cst_129 = arith.constant 3.000000e+00 : f32
      %323 = vector.broadcast %cst_129 : f32 to vector<12x128xf32>
      %324 = arith.subf %322, %323 : vector<12x128xf32>
      %325 = arith.mulf %324, %319 : vector<12x128xf32>
      %326 = arith.subf %325, %296 : vector<12x128xf32>
      %cst_130 = arith.constant 1.200000e+01 : f32
      %327 = vector.broadcast %cst_130 : f32 to vector<12x128xf32>
      %328 = arith.mulf %327, %320 : vector<12x128xf32>
      %cst_131 = arith.constant 3.000000e+00 : f32
      %329 = vector.broadcast %cst_131 : f32 to vector<12x128xf32>
      %330 = arith.subf %328, %329 : vector<12x128xf32>
      %cst_132 = arith.constant 0.00999999977 : f32
      %331 = vector.broadcast %cst_132 : f32 to vector<12x128xf32>
      %332 = arith.maximumf %330, %331 : vector<12x128xf32>
      %333 = tpu.reciprocal %332 {approx = true} : vector<12x128xf32> -> vector<12x128xf32>
      %334 = arith.mulf %326, %333 : vector<12x128xf32>
      %335 = arith.subf %319, %334 : vector<12x128xf32>
      %336 = arith.mulf %335, %335 : vector<12x128xf32>
      %cst_133 = arith.constant 4.000000e+00 : f32
      %337 = vector.broadcast %cst_133 : f32 to vector<12x128xf32>
      %338 = arith.mulf %337, %336 : vector<12x128xf32>
      %cst_134 = arith.constant 3.000000e+00 : f32
      %339 = vector.broadcast %cst_134 : f32 to vector<12x128xf32>
      %340 = arith.subf %338, %339 : vector<12x128xf32>
      %341 = arith.mulf %340, %335 : vector<12x128xf32>
      %342 = arith.subf %341, %296 : vector<12x128xf32>
      %cst_135 = arith.constant 1.200000e+01 : f32
      %343 = vector.broadcast %cst_135 : f32 to vector<12x128xf32>
      %344 = arith.mulf %343, %336 : vector<12x128xf32>
      %cst_136 = arith.constant 3.000000e+00 : f32
      %345 = vector.broadcast %cst_136 : f32 to vector<12x128xf32>
      %346 = arith.subf %344, %345 : vector<12x128xf32>
      %cst_137 = arith.constant 0.00999999977 : f32
      %347 = vector.broadcast %cst_137 : f32 to vector<12x128xf32>
      %348 = arith.maximumf %346, %347 : vector<12x128xf32>
      %349 = tpu.reciprocal %348 {approx = true} : vector<12x128xf32> -> vector<12x128xf32>
      %350 = arith.mulf %342, %349 : vector<12x128xf32>
      %351 = arith.subf %335, %350 : vector<12x128xf32>
      %cst_138 = arith.constant 5.000000e-01 : f32
      %cst_139 = arith.constant 1.000000e+00 : f32
      %352 = vector.broadcast %cst_138 : f32 to vector<12x128xf32>
      %353 = arith.maximumf %352, %351 : vector<12x128xf32>
      %354 = vector.broadcast %cst_139 : f32 to vector<12x128xf32>
      %355 = arith.minimumf %354, %353 : vector<12x128xf32>
      %cst_140 = arith.constant 2.000000e+00 : f32
      %356 = vector.broadcast %cst_140 : f32 to vector<12x128xf32>
      %357 = arith.mulf %356, %273 : vector<12x128xf32>
      %358 = arith.mulf %357, %355 : vector<12x128xf32>
      %359 = arith.addf %251, %358 : vector<12x128xf32>
      %cst_141 = arith.constant 9.99999996E-13 : f32
      %360 = vector.broadcast %cst_141 : f32 to vector<12x128xf32>
      %361 = arith.cmpf ogt, %267, %360 : vector<12x128xf32>
      %362 = arith.select %361, %359, %251 : vector<12x128xi1>, vector<12x128xf32>
      %363 = arith.subf %249, %362 : vector<12x128xf32>
      %cst_142 = arith.constant 5.000000e-01 : f32
      %364 = vector.broadcast %cst_142 : f32 to vector<12x128xf32>
      %365 = arith.mulf %364, %363 : vector<12x128xf32>
      %366 = arith.subf %211, %365 : vector<12x128xf32>
      %367 = math.absf %366 : vector<12x128xf32>
      %cst_143 = arith.constant 0.000000e+00 : f32
      %368 = vector.broadcast %cst_143 : f32 to vector<12x128xf32>
      %369 = arith.select %55, %367, %368 : vector<12x128xi1>, vector<12x128xf32>
      %cst_144 = arith.constant dense<0.000000e+00> : vector<128xf32>
      %370 = vector.multi_reduction <add>, %369, %cst_144 [0] : vector<12x128xf32> to vector<128xf32>
      %371 = vector.shape_cast %370 : vector<128xf32> to vector<1x128xf32>
      %372 = arith.addf %44, %371 : vector<1x128xf32>
      %c0_145 = arith.constant 0 : index
      %c0_146 = arith.constant 0 : index
      %c0_147 = arith.constant 0 : index
      %c0_148 = arith.constant 0 : index
      %373 = vector.load %arg7[%c0_145, %c0_146, %c0_147, %c0_148] : memref<1x1x1x128xf32, #tpu.memory_space<vmem>>, vector<1x1x1x128xf32>
      %374 = vector.shape_cast %373 : vector<1x1x1x128xf32> to vector<1x128xf32>
      %375 = vector.shape_cast %372 : vector<1x128xf32> to vector<1x1x1x128xf32>
      tpu.vector_store %arg7[%c0_145, %c0_146, %c0_147, %c0_148], %375 {strides = array<i32>} : memref<1x1x1x128xf32, #tpu.memory_space<vmem>>, vector<1x1x1x128xf32>,
    } else {
    }
    %cst_22 = arith.constant 0.000000e+00 : f32
    %41 = arith.cmpf oeq, %37, %cst_22 : f32
    %42 = arith.extui %41 : i1 to i32
    %c0_i32_23 = arith.constant 0 : i32
    %43 = arith.cmpi ne, %42, %c0_i32_23 : i32
    scf.if %43 {
      %cst_24 = arith.constant 0.000000e+00 : f32
      %44 = vector.broadcast %cst_24 : f32 to vector<1x128xf32>
      %c0_25 = arith.constant 0 : index
      %c0_26 = arith.constant 0 : index
      %c0_27 = arith.constant 0 : index
      %c0_28 = arith.constant 0 : index
      %45 = vector.load %arg7[%c0_25, %c0_26, %c0_27, %c0_28] : memref<1x1x1x128xf32, #tpu.memory_space<vmem>>, vector<1x1x1x128xf32>
      %46 = vector.shape_cast %45 : vector<1x1x1x128xf32> to vector<1x128xf32>
      %47 = vector.shape_cast %44 : vector<1x128xf32> to vector<1x1x1x128xf32>
      tpu.vector_store %arg7[%c0_25, %c0_26, %c0_27, %c0_28], %47 {strides = array<i32>} : memref<1x1x1x128xf32, #tpu.memory_space<vmem>>, vector<1x1x1x128xf32>,
    } else {
    }
    return
  }
  func.func @transform_0(%arg0: i32, %arg1: i32) -> i32 {
    %c0_i32 = arith.constant 0 : i32
    %c0_i32_0 = arith.constant 0 : i32
    return %c0_i32 : i32
  }
  func.func @transform_1(%arg0: i32, %arg1: i32) -> i32 {
    %c0_i32 = arith.constant 0 : i32
    %c0_i32_0 = arith.constant 0 : i32
    return %c0_i32 : i32
  }
  func.func @transform_2(%arg0: i32, %arg1: i32) -> (i32, i32, i32, i32) {
    %c0_i32 = arith.constant 0 : i32
    %c0_i32_0 = arith.constant 0 : i32
    %c0_i32_1 = arith.constant 0 : i32
    return %arg0, %c0_i32, %arg1, %c0_i32_0 : i32, i32, i32, i32
  }
  func.func @transform_3(%arg0: i32, %arg1: i32) -> (i32, i32, i32, i32) {
    %c0_i32 = arith.constant 0 : i32
    %c0_i32_0 = arith.constant 0 : i32
    %c0_i32_1 = arith.constant 0 : i32
    return %arg0, %c0_i32, %arg1, %c0_i32_0 : i32, i32, i32, i32
  }
  func.func @transform_4(%arg0: i32, %arg1: i32) -> (i32, i32, i32, i32) {
    %c0_i32 = arith.constant 0 : i32
    %c0_i32_0 = arith.constant 0 : i32
    %c0_i32_1 = arith.constant 0 : i32
    return %arg0, %c0_i32, %arg1, %c0_i32_0 : i32, i32, i32, i32
  }
  func.func @transform_5(%arg0: i32, %arg1: i32) -> (i32, i32, i32, i32) {
    %c0_i32 = arith.constant 0 : i32
    %c0_i32_0 = arith.constant 0 : i32
    %c0_i32_1 = arith.constant 0 : i32
    return %arg0, %arg1, %c0_i32, %c0_i32_0 : i32, i32, i32, i32
  }
  func.func @transform_6(%arg0: i32, %arg1: i32) -> (i32, i32, i32, i32) {
    %c0_i32 = arith.constant 0 : i32
    %c0_i32_0 = arith.constant 0 : i32
    %c0_i32_1 = arith.constant 0 : i32
    return %arg0, %arg1, %c0_i32, %c0_i32_0 : i32, i32, i32, i32
  }
}

</mosaic_0001>

<bundles_post_ra>
// kernel: tpu_custom_call.1
= control target key start
LH: loop header
LB: loop body
LE: loop exit
PB: predicated region body
PF: predicated region fallthrough
CT: control target
= control target key end

     0   :  { %s2011_s0 = inlined_call_operand.vmem [shape: f32[6], index: 0, kind: input, shape index: {}]   ;;  %s2012_s1 = inlined_call_operand.vmem [shape: f32[6], index: 1, kind: input, shape index: {}]   ;;  %s2013_s2 = inlined_call_operand.vmem [shape: f32[2,6,12,128], index: 2, kind: input, shape index: {}]   ;;  %s2014_s3 = inlined_call_operand.vmem [shape: f32[2,6,12,128], index: 3, kind: input, shape index: {}]   ;;  %s2015_s4 = inlined_call_operand.vmem [shape: f32[2,1,12,128], index: 4, kind: input, shape index: {}]   ;;  %s2016_s5 = inlined_call_operand.hbm [shape: f32[2,1,1,128], index: 5, kind: output, shape index: {0}]   ;;  %s2017_s6 = inlined_call_operand.hbm [shape: f32[2,1,1,128], index: 6, kind: output, shape index: {1}]  }
   0x1   :  { %2022 = sst [smem:[#allocation14_spill]] %s2011_s0 }
   0x2   :  { %2023 = sst [smem:[#allocation15_spill]] %s2012_s1 }
   0x3   :  { %2024 = sst [smem:[#allocation16_spill]] %s2013_s2 }
   0x4   :  { %2025 = sst [smem:[#allocation17_spill]] %s2014_s3 }
   0x5   :  { %2026 = sst [smem:[#allocation18_spill]] %s2015_s4 }
   0x6   :  { %12 = vsyncpa [#allocation4], 0 }
   0x7   :  { %13 = vsyncpa [#allocation6], 0 }
   0x8   :  { %14 = vsyncpa [#allocation3], 0 }
   0x9   :  { %16 = vsyncpa [#allocation3 + $0x1], 0 }
   0xa   :  { %17 = vsyncpa [#allocation9], 0 }
   0xb   :  { %19 = vsyncpa [#allocation9 + $0x1], 0  ;;  %s1502_s21 = smov 0   ;;  %s1504_s22 = smov 0  }
   0xc   :  { %s1506_s23 = smov 0   ;;  %s1508_s24 = smov 0  }
   0xd   :  { %s1510_s25 = smov 0   ;;  %s1512_s26 = smov 0  }
   0xe LB: > { %s1125_s27 = sadd.s32 4294967295, %s1459_s26   ;;  %s1126_s28 = sadd.s32 4294967294, %s1459_s26   ;;  %s1459_s26 = sphi %s1512_s26, %s25_s26   ;;  %s1455_s25 = sphi %s1510_s25, %s2045_s25   ;;  %s1451_s24 = sphi %s1508_s24, %s2044_s24   ;;  %s1447_s23 = sphi %s1506_s23, %s2043_s23   ;;  %s1443_s22 = sphi %s1504_s22, %s2042_s22   ;;  %s1439_s21 = sphi %s1502_s21, %s2041_s21  }
   0xf   : > { %s37_s29 = sadd.s32 1, %s1455_s25  ;;  %s172_s30 = sadd.s32 1, %s1447_s23 }
  0x10   : > { %p39_p0 = scmp.ge.s32.totalorder %s37_s29, 2  ;;  %p182_p1 = scmp.ne.s32.totalorder %s1447_s23, %s1443_s22 }
  0x11   : > { %p183_p2 = scmp.eq.s32.totalorder %s1125_s27, 1  ;;  %p188_p3 = scmp.ne.s32.totalorder %s1443_s22, %s1439_s21 }
  0x12   : > { %s2047_s29 = smov (%p39_p0, %s37_s29), 0  ;;  %p189_p5 = scmp.eq.s32.totalorder %s1126_s28, 1 }
  0x13   : > { %p1542_p4 = por %p183_p2, %p182_p1  ;;  %s167_s8 = ssub.s32 %s1455_s25, %s2047_s29 }
  0x14   : > { %p1127_p6 = scmp.ge.s32.totalorder %s1459_s26, 1  ;;  %p170_p7 = scmp.eq.s32.totalorder %s167_s8, 0 }
  0x15   : > { %s2027_s7 = scalar_select %p1542_p4, 1, 0 }
  0x16   : > { %p1549_p8 = por %p189_p5, %p188_p3  ;;  %p224_p9 = scmp.lt.s32.totalorder %s1459_s26, 3 }
  0x17   : > { %s1555_s10 = scalar_select %p170_p7, %s1447_s23, %s172_s30  }
  0x18   : > { %s2028_s9 = scalar_select %p1549_p8, 1, 0 }
  0x19   : > { %p1557_p10 = pnand %p1127_p6, %p224_p9  ;;  %p1561_p11 = scmp.eq.s32.totalorder %s1125_s27, 0 }
  0x1a   : > { %s2031_s0 = sld [smem:[#allocation14_spill]]  ;;  %s2032_s1 = sld [smem:[#allocation15_spill]] }
  0x1b   : > { %s2029_s11 = scalar_select %p1557_p10, 1, 0 }
  0x1c   : > { %s2030_s12 = scalar_select %p1561_p11, 1, 0 }
  0x1d   : > { %p1208_p12 = pneg %p1557_p10 }
  0x1f   : > { %p1575_p13 = pnand %p1561_p11, %p1208_p12 }
  0x20   : > { %s237_s15 = sshll.u32 %s2031_s0, 4  ;;  %s248_s18 = sshll.u32 %s2032_s1, 4  ;;  %s238_s15 = int_to_ptr.vmem [resolvable:$true] %s237_s15  ;;  %s249_s18 = int_to_ptr.vmem [resolvable:$true] %s248_s18 }
  0x21   : > { %s1311_s20 = scalar_lea.vmem %s238_s15, 16  ;;  %p1313_p1 = pneg %p1575_p13 }
  0x22   : > { %p1312_p0 = scmp.ne.s32.totalorder %s238_s15, %s1311_s20  ;;  %p1319_p5 = scmp.lt.s32.totalorder %s238_s15, %s238_s15 }
  0x23   : > { %p1320_p6 = scmp.lt.s32.totalorder %s1311_s20, %s1311_s20 }
  0x24   : > { %p1314_p2 = pnand %p1313_p1, %p1312_p0 }
  0x25   : > { %p1321_p7 = por %p1320_p6, %p1319_p5 }
  0x26   : > { %p1315_p3 = pneg %p1314_p2 }
  0x28   : > { %p1322_p9 = pnand %p1321_p7, %p1315_p3 }
  0x2a   : > { %1325 = shalt.err (!%p1322_p9)
}
  0x2b   : > { %s1461_s27 = smov [#allocation2]   ;;  %s1326_s28 = scalar_lea.vmem %s249_s18, 16 }
  0x2c   : > { %1211 = dma.vmem_to_smem (!%p1575_p13), %s238_s15, 16, %s1461_s27, [#allocation4]  }
  0x2d   : > { %p1327_p12 = scmp.ne.s32.totalorder %s249_s18, %s1326_s28  ;;  %p1334_p11 = scmp.lt.s32.totalorder %s249_s18, %s249_s18 }
  0x2e   : > { %p1335_p10 = scmp.lt.s32.totalorder %s1326_s28, %s1326_s28 }
  0x2f   : > { %p1329_p8 = pnand %p1327_p12, %p1313_p1 }
  0x30   : > { %p1336_p0 = por %p1335_p10, %p1334_p11 }
  0x31   : > { %p1330_p4 = pneg %p1329_p8 }
  0x33   : > { %p1337_p2 = pnand %p1336_p0, %p1330_p4 }
  0x35   : > { %1340 = shalt.err (!%p1337_p2)
}
  0x36   : > { %s1462_s30 = smov [#allocation5]   ;;  %p2034_p3 = scmp.ne.s32.totalorder %s2029_s11, 0 }
  0x37   : > { %1214 = dma.vmem_to_smem (!%p1575_p13), %s249_s18, 16, %s1462_s30, [#allocation6]  }
  0x38   : > { %300 = sbr.rel (%p2034_p3) target bundleno = 559 (0x22f), region = 40  ;;  %p2035_p5 = scmp.ne.s32.totalorder (!%p2034_p3), %s2030_s12, 0 }
  0x3f   : > { %1422 = dma.done.wait (%p2035_p5), [#allocation4], 16  }
  0x40   : > { %1424 = vsyncadd (%p2035_p5), [#allocation4], 4294967280 }
  0x41   : > { %1426 = dma.done.wait (%p2035_p5), [#allocation6], 16  }
  0x42   : > { %1428 = vsyncadd (%p2035_p5), [#allocation6], 4294967280 }
  0x43   : > { %310 = sfence }
  0x44   : > { %s1596_s8 = sand.u32 1, %s1443_s22   ;;  %p361_p4 = scmp.lt.s32.totalorder %s1451_s24, 1  ;;  %v405_v0 = vlaneseq  ;;  %vm419_vm1 = vcmask 1043456   ;;  %v1463_v5 = vmov 0.0   ;;  %vm430_vm5 = vcmask 1040384  }
  0x45   : > { %s1600_s13 = sld [smem:[#allocation2]]  ;;  %s1602_s14 = sld [smem:[#allocation2 + $0x1]] }
  0x46   : > { %s362_s11 = scalar_select %p361_p4, %s1451_s24, 1  ;;  %v406_v1 = vshrl.u32 %v405_v0, 7 }
  0x47   : > { %s2036_s4 = sld [smem:[#allocation18_spill]]  ;;  %s1611_s19 = sld [smem:[#allocation2 + $0x2]] }
  0x48   : > { %s1193_s15 = smul.u32 96, %s362_s11  ;;  %s1192_s16 = sshll.u32 %s362_s11, 4  ;;  %v1604_v2 = vadd.s32 8, %v406_v1 }
  0x49   : > { %s2037_s2 = sld [smem:[#allocation16_spill]]  ;;  %s2038_s3 = sld [smem:[#allocation17_spill]] }
  0x4a   : > { %vm414_vm0 = vcmp.lt.s32.totalorder %v1604_v2, 12  ;;  %s1628_s12 = sld [smem:[#allocation2 + $0x4]]  ;;  %s1630_s17 = sld [smem:[#allocation2 + $0x5]] }
  0x4b   : > { %s1632_s20 = sld [smem:[#allocation5]]  ;;  %s1636_s0 = sld [smem:[#allocation5 + $0x1]] }
  0x4c   : > { %s1640_s27 = sld [smem:[#allocation5 + $0x3]]  ;;  %s1642_s30 = sld [smem:[#allocation5 + $0x4]] }
  0x4d   : > { %s1609_s18 = scalar_lea.vmem %s2036_s4, %s1192_s16  ;;  %s1626_s16 = sld [smem:[#allocation2 + $0x3]] }
  0x4e   : > { %v403_v3 = vld [vmem:[%s1609_s18] sm:$0xff]  ;;  %v404_v4 = vld [vmem:[%s1609_s18 + $0x8] sm:$0xf]  ;;  %s1645_s1 = sld [smem:[#allocation5 + $0x5]]  ;;  %s1654_s4 = scalar_lea.vmem [#allocation7], %s1596_s8 }
  0x4f   : > { %s1616_s28 = scalar_lea.vmem %s2037_s2, %s1193_s15  ;;  %s1621_s11 = scalar_lea.vmem %s2038_s3, %s1193_s15  ;;  %vm411_vm2 = vcmp.eq.f32.partialorder %v403_v3, 1.0  ;;  %vm412_vm3 = vcmp.eq.f32.partialorder %v404_v4, 1.0 }
  0x50   : > { %vm416_vm4 = vmand %vm412_vm3, %vm414_vm0  ;;  %v417_v6 = vsel %vm411_vm2, 1.0, %v1463_v5  ;;  %s1638_s15 = sld [smem:[#allocation5 + $0x2]]  ;;  %s359_s2 = scalar_lea.vmem [#allocation8], %s1596_s8 }
  0x51   : > { %v418_v7 = vsel %vm416_vm4, 1.0, %v1463_v5 }
  0x52   : > { %v420_v8 = vsel %vm419_vm1, %v418_v7, 0.0 }
  0x53   : > { %v421_v9 = vadd.f32 %v420_v8, %v417_v6 }
  0x55   : > { %v422_v10 = vrot.slane %v421_v9, 4 }
  0x57   : > { %v423_v11 = vadd.f32 %v422_v10, %v421_v9 }
  0x59   : > { %v424_v12 = vrot.slane %v423_v11, 2 }
  0x5b   : > { %v425_v13 = vadd.f32 %v424_v12, %v423_v11 }
  0x5d   : > { %v426_v14 = vrot.slane %v425_v13, 1 }
  0x5f   : > { %v427_v15 = vadd.f32 %v426_v14, %v425_v13 }
  0x61   : > { %429 = vst [vmem:[%s359_s2] sm:$0x1] %v427_v15  ;;  %v431_v16 = vsel %vm430_vm5, %v427_v15, 0.0 }
  0x62   : > { %432 = vadd.xlane.f32.xlu0 %v431_v16 }
  0xef   : > { %v433_v17 = vpop.xlane.xlu0 %432 }
  0xf0   : > { %v434_v18 = vrot.slane %v433_v17, 4 }
  0xf2   : > { %v435_v19 = vadd.f32 %v434_v18, %v433_v17 }
  0xf4   : > { %v436_v20 = vrot.slane %v435_v19, 2 }
  0xf6   : > { %v437_v21 = vadd.f32 %v436_v20, %v435_v19 }
  0xf8   : > { %v438_v22 = vrot.slane %v437_v21, 1 }
  0xfa   : > { %v439_v23 = vadd.f32 %v438_v22, %v437_v21 }
  0xfc   : > { %1194 = vpush %v439_v23 }
 0x12d   : > { %s1650_s3 = spop %1194 }
 0x12e   : > { %p441_p8 = scmp.gt.f32.partialorder %s1650_s3, 0.0 }
 0x12f   : > { %v451_v24 = vld [vmem:[%s1616_s28] sm:$0xff] (%p441_p8)  ;;  %v1658_v25 = vstv (%p441_p8), %s1632_s20  ;;  %v452_v26 = vld [vmem:[%s1616_s28 + $0x8] sm:$0xf] (%p441_p8)  ;;  %v1663_v28 = vstv (%p441_p8), %s1600_s13 }
 0x130   : > { %444 = sbr.rel (!%p441_p8) target bundleno = 501 (0x1f5), region = 52  ;;  %v454_v27 = vmul.f32 (%p441_p8), %v1658_v25, %v451_v24  ;;  %v1148_v29 = vld [vmem:[%s1616_s28 + $0x10] sm:$0xff] (%p441_p8)  ;;  %v1150_v30 = vld [vmem:[%s1616_s28 + $0x20] sm:$0xff] (%p441_p8)  ;;  %v455_v31 = vmul.f32 (%p441_p8), %v1658_v25, %v452_v26  ;;  %v1149_v32 = vld [vmem:[%s1616_s28 + $0x18] sm:$0xf] (%p441_p8)  ;;  %v1670_v33 = vstv (%p441_p8), %s1636_s0 }
 0x131   : > { %v1673_v34 = vstv (%p441_p8), %s1602_s14  ;;  %v1151_v35 = vld [vmem:[%s1616_s28 + $0x28] sm:$0xf] (%p441_p8)  ;;  %v463_v37 = vmul.f32 (%p441_p8), %v1148_v29, %v1670_v33  ;;  %v464_v38 = vmul.f32 (%p441_p8), %v1149_v32, %v1670_v33  ;;  %v1680_v39 = vstv (%p441_p8), %s1638_s15  ;;  %v1152_v40 = vld [vmem:[%s1616_s28 + $0x30] sm:$0xff] (%p441_p8) }
 0x132   : > { %v457_v36 = vadd.f32 (%p441_p8), %v1663_v28, %v454_v27  ;;  %v1153_v41 = vld [vmem:[%s1616_s28 + $0x38] sm:$0xf] (%p441_p8)  ;;  %v458_v42 = vadd.f32 (%p441_p8), %v1663_v28, %v455_v31  ;;  %v472_v43 = vmul.f32 (%p441_p8), %v1150_v30, %v1680_v39  ;;  %v473_v44 = vmul.f32 (%p441_p8), %v1151_v35, %v1680_v39  ;;  %v1154_v50 = vld [vmem:[%s1616_s28 + $0x40] sm:$0xff] (%p441_p8)  ;;  %v1155_v51 = vld [vmem:[%s1616_s28 + $0x48] sm:$0xf] (%p441_p8) }
 0x133   : > { %v1688_v45 = vstv (%p441_p8), %s1611_s19  ;;  %v1691_v46 = vadd.f32 (%p441_p8), %v1673_v34, %v463_v37  ;;  %v1694_v47 = vadd.f32 (%p441_p8), %v1673_v34, %v464_v38  ;;  %v1697_v48 = vstv (%p441_p8), %s1640_s27  ;;  %v1156_v56 = vld [vmem:[%s1616_s28 + $0x50] sm:$0xff] (%p441_p8)  ;;  %v1157_v57 = vld [vmem:[%s1616_s28 + $0x58] sm:$0xf] (%p441_p8) }
 0x134   : > { %v1700_v49 = vstv (%p441_p8), %s1626_s16  ;;  %v1705_v52 = vadd.f32 (%p441_p8), %v1688_v45, %v472_v43  ;;  %v1708_v53 = vadd.f32 (%p441_p8), %v1688_v45, %v473_v44  ;;  %v481_v54 = vmul.f32 (%p441_p8), %v1152_v40, %v1697_v48  ;;  %v690_v21 = vld [vmem:[%s1621_s11] sm:$0xff] (%p441_p8)  ;;  %v691_v22 = vld [vmem:[%s1621_s11 + $0x8] sm:$0xf] (%p441_p8) }
 0x135   : > { %v482_v55 = vmul.f32 (%p441_p8), %v1153_v41, %v1697_v48  ;;  %v1715_v58 = vstv (%p441_p8), %s1642_s30  ;;  %v1718_v59 = vstv (%p441_p8), %s1628_s12  ;;  %v1721_v60 = vstv (%p441_p8), %s1645_s1 }
 0x136   : > { %v1724_v61 = vstv (%p441_p8), %s1630_s17  ;;  %v484_v62 = vadd.f32 (%p441_p8), %v1700_v49, %v481_v54  ;;  %v490_v0 = vmul.f32 (%p441_p8), %v1154_v50, %v1715_v58  ;;  %v491_v1 = vmul.f32 (%p441_p8), %v1155_v51, %v1715_v58 }
 0x137   : > { %v485_v63 = vadd.f32 %v1700_v49, %v482_v55  ;;  %v499_v3 = vmul.f32 %v1156_v56, %v1721_v60  ;;  %v500_v4 = vmul.f32 %v1157_v57, %v1721_v60  ;;  %v516_v5 = vmul.f32 %v1691_v46, %v1691_v46 }
 0x138   : > { %v517_v6 = vmul.f32 %v1694_v47, %v1694_v47  ;;  %v493_v7 = vadd.f32 %v1718_v59, %v490_v0  ;;  %v494_v8 = vadd.f32 %v1718_v59, %v491_v1  ;;  %v504_v9 = vadd.f32 %v484_v62, %v457_v36 }
 0x139   : > { %v505_v10 = vadd.f32 %v485_v63, %v458_v42  ;;  %v502_v11 = vadd.f32 %v1724_v61, %v499_v3  ;;  %v503_v12 = vadd.f32 %v1724_v61, %v500_v4  ;;  %v518_v13 = vmul.f32 %v1705_v52, %v1705_v52 }
 0x13a   : > { %v519_v14 = vmul.f32 %v1708_v53, %v1708_v53  ;;  %v522_v15 = vmul.f32 %v493_v7, %v493_v7  ;;  %v523_v16 = vmul.f32 %v494_v8, %v494_v8  ;;  %v556_v23 = vmul.f32 %v493_v7, %v1705_v52 }
 0x13b   : > { %v1744_v17 = vadd.f32 %v504_v9, %v502_v11  ;;  %v1746_v18 = vadd.f32 %v505_v10, %v503_v12  ;;  %v520_v19 = vadd.f32 %v518_v13, %v516_v5  ;;  %v557_v24 = vmul.f32 %v494_v8, %v1708_v53  ;;  %v1168_v5 = vld [vmem:[%s1621_s11 + $0x10] sm:$0xff]  ;;  %v1169_v10 = vld [vmem:[%s1621_s11 + $0x18] sm:$0xf] }
 0x13c   : > { %v521_v20 = vadd.f32 %v519_v14, %v517_v6  ;;  %v564_v31 = vmul.f32 %v493_v7, %v1691_v46  ;;  %v565_v32 = vmul.f32 %v494_v8, %v1694_v47  ;;  %v692_v35 = vmul.f32 %v690_v21, %v1658_v25 }
 0x13d   : > { %v1753_v26 = vmul.f32 0.33333334, %v1744_v17  ;;  %v1756_v27 = vmul.f32 0.33333334, %v1746_v18  ;;  %v524_v29 = vadd.f32 %v522_v15, %v520_v19  ;;  %v693_v37 = vmul.f32 %v691_v22, %v1658_v25 }
 0x13e   : > { %v525_v30 = vadd.f32 %v523_v16, %v521_v20  ;;  %v699_v22 = vmul.f32 %v1168_v5, %v1670_v33 }
 0x13f   : > { %v510_v38 = vsub.f32 %v457_v36, %v1753_v26  ;;  %v511_v40 = vsub.f32 %v458_v42, %v1756_v27  ;;  %v512_v41 = vsub.f32 %v484_v62, %v1753_v26  ;;  %v513_v43 = vsub.f32 %v485_v63, %v1756_v27 }
 0x140   : > { %v514_v44 = vsub.f32 %v502_v11, %v1753_v26  ;;  %v515_v50 = vsub.f32 %v503_v12, %v1756_v27  ;;  %v536_v51 = vmul.f32 2.0, %v524_v29  ;;  %v537_v54 = vmul.f32 2.0, %v525_v30 }
 0x141   : > { %v526_v55 = vmul.f32 %v510_v38, %v510_v38  ;;  %v527_v56 = vmul.f32 %v511_v40, %v511_v40  ;;  %v528_v57 = vmul.f32 %v512_v41, %v512_v41  ;;  %v529_v25 = vmul.f32 %v513_v43, %v513_v43 }
 0x142   : > { %v532_v0 = vmul.f32 %v514_v44, %v514_v44  ;;  %v533_v36 = vmul.f32 %v515_v50, %v515_v50  ;;  %v548_v1 = vmul.f32 %v514_v44, %v512_v41  ;;  %v549_v42 = vmul.f32 %v515_v50, %v513_v43 }
 0x143   : > { %v530_v3 = vadd.f32 %v528_v57, %v526_v55  ;;  %v531_v62 = vadd.f32 %v529_v25, %v527_v56  ;;  %v554_v63 = vmul.f32 %v514_v44, %v1691_v46  ;;  %v555_v4 = vmul.f32 %v515_v50, %v1694_v47 }
 0x144   : > { %v550_v6 = vsub.f32 %v548_v1, %v522_v15  ;;  %v551_v7 = vsub.f32 %v549_v42, %v523_v16  ;;  %v566_v8 = vmul.f32 %v512_v41, %v1705_v52  ;;  %v567_v9 = vmul.f32 %v513_v43, %v1708_v53  ;;  %v1177_v42 = vld [vmem:[%s1621_s11 + $0x58] sm:$0xf] }
 0x145   : > { %v534_v11 = vadd.f32 %v532_v0, %v530_v3  ;;  %v535_v12 = vadd.f32 %v533_v36, %v531_v62  ;;  %v558_v13 = vsub.f32 %v554_v63, %v556_v23  ;;  %v559_v14 = vsub.f32 %v555_v4, %v557_v24  ;;  %v1170_v23 = vld [vmem:[%s1621_s11 + $0x20] sm:$0xff]  ;;  %v1171_v24 = vld [vmem:[%s1621_s11 + $0x28] sm:$0xf] }
 0x146   : > { %v552_v19 = vmul.f32 %v550_v6, %v510_v38  ;;  %v568_v20 = vsub.f32 %v564_v31, %v566_v8  ;;  %v569_v21 = vsub.f32 %v565_v32, %v567_v9  ;;  %v700_v30 = vmul.f32 %v1169_v10, %v1670_v33  ;;  %v1172_v38 = vld [vmem:[%s1621_s11 + $0x30] sm:$0xff]  ;;  %v1175_v0 = vld [vmem:[%s1621_s11 + $0x48] sm:$0xf] }
 0x147   : > { %v1775_v15 = vadd.f32 %v536_v51, %v534_v11  ;;  %v1777_v16 = vadd.f32 %v537_v54, %v535_v12  ;;  %v560_v29 = vmul.f32 %v558_v13, %v1691_v46  ;;  %v553_v41 = vmul.f32 %v551_v7, %v511_v40  ;;  %v1173_v51 = vld [vmem:[%s1621_s11 + $0x38] sm:$0xf] }
 0x148   : > { %v561_v43 = vmul.f32 %v559_v14, %v1694_v47  ;;  %v570_v50 = vmul.f32 %v568_v20, %v1705_v52  ;;  %v571_v46 = vmul.f32 %v569_v21, %v1708_v53  ;;  %v694_v33 = vadd.f32 %v692_v35, %v1663_v28  ;;  %v1174_v47 = vld [vmem:[%s1621_s11 + $0x40] sm:$0xff] }
 0x149   : > { %v540_v31 = vmax.f32 %v1775_v15, 1e-20  ;;  %v541_v32 = vmax.f32 %v1777_v16, 1e-20  ;;  %v562_v44 = vsub.f32 %v552_v19, %v560_v29  ;;  %v695_v40 = vadd.f32 %v693_v37, %v1663_v28  ;;  %v1176_v28 = vld [vmem:[%s1621_s11 + $0x50] sm:$0xff] }
 0x14a   : > { %v1794_v56 = vadd.f32 %v699_v22, %v1673_v34  ;;  %v1797_v57 = vadd.f32 %v700_v30, %v1673_v34  ;;  %v706_v25 = vmul.f32 %v1170_v23, %v1680_v39  ;;  %v707_v52 = vmul.f32 %v1171_v24, %v1680_v39 }
 0x14b   : > { %v542_v54 = vmul.f32 0.16666667, %v540_v31  ;;  %v543_v55 = vmul.f32 0.16666667, %v541_v32  ;;  %v713_v53 = vmul.f32 %v1172_v38, %v1697_v48  ;;  %v714_v35 = vmul.f32 %v1173_v51, %v1697_v48 }
 0x14c   : > { %v563_v37 = vsub.f32 %v553_v41, %v561_v43  ;;  %v572_v36 = vadd.f32 %v570_v50, %v562_v44  ;;  %v720_v1 = vmul.f32 %v1174_v47, %v1715_v58  ;;  %v1808_v34 = vadd.f32 %v706_v25, %v1688_v45 }
 0x14d   : > { %1279 = vrsqrt.f32 %v542_v54  ;;  %v1811_v3 = vadd.f32 %v707_v52, %v1688_v45  ;;  %v715_v39 = vadd.f32 %v713_v53, %v1700_v49  ;;  %v716_v62 = vadd.f32 %v714_v35, %v1700_v49 }
 0x14e   : > { %1281 = vrsqrt.f32 %v543_v55  ;;  %v721_v48 = vmul.f32 %v1175_v0, %v1715_v58  ;;  %v1817_v63 = vadd.f32 %v720_v1, %v1718_v59  ;;  %v727_v4 = vmul.f32 %v1176_v28, %v1721_v60 }
 0x14f   : > { %v728_v5 = vmul.f32 %v1177_v42, %v1721_v60  ;;  %v731_v6 = vadd.f32 %v715_v39, %v694_v33  ;;  %v743_v7 = vmul.f32 %v1794_v56, %v1794_v56  ;;  %v744_v45 = vmul.f32 %v1797_v57, %v1797_v57 }
 0x150   : > { %v723_v8 = vadd.f32 %v721_v48, %v1718_v59  ;;  %v729_v49 = vadd.f32 %v727_v4, %v1724_v61  ;;  %v732_v9 = vadd.f32 %v716_v62, %v695_v40  ;;  %v745_v58 = vmul.f32 %v1808_v34, %v1808_v34 }
 0x151   : > { %v573_v10 = vadd.f32 %v571_v46, %v563_v37  ;;  %v730_v11 = vadd.f32 %v728_v5, %v1724_v61  ;;  %v746_v60 = vmul.f32 %v1811_v3, %v1811_v3  ;;  %v1834_v12 = vmul.f32 %v1817_v63, %v1817_v63 }
 0x152   : > { %v1836_v13 = vadd.f32 %v731_v6, %v729_v49  ;;  %v747_v14 = vadd.f32 %v745_v58, %v743_v7  ;;  %v1838_v59 = vmul.f32 %v723_v8, %v723_v8  ;;  %v574_v21 = vmul.f32 0.5, %v572_v36 }
 0x153   : > { %v1840_v19 = vadd.f32 %v732_v9, %v730_v11  ;;  %v748_v20 = vadd.f32 %v746_v60, %v744_v45  ;;  %v575_v61 = vmul.f32 0.5, %v573_v10  ;;  %v783_v41 = vmul.f32 %v1817_v63, %v1808_v34 }
 0x154   : > { %v1843_v22 = vmul.f32 0.33333334, %v1836_v13  ;;  %v751_v30 = vadd.f32 %v1834_v12, %v747_v14  ;;  %v784_v28 = vmul.f32 %v723_v8, %v1811_v3  ;;  %v791_v14 = vmul.f32 %v1817_v63, %v1794_v56 }
 0x155   : > { %v1846_v29 = vmul.f32 0.33333334, %v1840_v19  ;;  %v752_v31 = vadd.f32 %v1838_v59, %v748_v20  ;;  %vm680_vm14 = vcmp.gt.f32.partialorder %v1775_v15, 1e-12  ;;  %vm681_vm15 = vcmp.gt.f32.partialorder %v1777_v16, 1e-12 }
 0x156   : > { %v737_v23 = vsub.f32 %v694_v33, %v1843_v22  ;;  %v739_v24 = vsub.f32 %v715_v39, %v1843_v22  ;;  %v741_v38 = vsub.f32 %v729_v49, %v1843_v22  ;;  %v763_v1 = vmul.f32 2.0, %v751_v30 }
 0x157   : > { %v1280_v43 = vpop.eup %1279  ;;  %v738_v51 = vsub.f32 %v695_v40, %v1846_v29  ;;  %v740_v46 = vsub.f32 %v716_v62, %v1846_v29  ;;  %v742_v52 = vsub.f32 %v730_v11, %v1846_v29  ;;  %v764_v48 = vmul.f32 2.0, %v752_v31 }
 0x158   : > { %v1282_v32 = vpop.eup %1281  ;;  %v1855_v44 = vmul.f32 %v1280_v43, %v542_v54  ;;  %v576_v50 = vmul.f32 %v1280_v43, %v1280_v43  ;;  %v753_v33 = vmul.f32 %v737_v23, %v737_v23  ;;  %v755_v0 = vmul.f32 %v739_v24, %v739_v24 }
 0x159   : > { %v1859_v47 = vmul.f32 %v1282_v32, %v543_v55  ;;  %v577_v25 = vmul.f32 %v1282_v32, %v1282_v32  ;;  %v754_v35 = vmul.f32 %v738_v51, %v738_v51  ;;  %v756_v36 = vmul.f32 %v740_v46, %v740_v46 }
 0x15a   : > { %v578_v53 = vmul.f32 %v576_v50, %v574_v21  ;;  %v759_v54 = vmul.f32 %v741_v38, %v741_v38  ;;  %v757_v39 = vadd.f32 %v755_v0, %v753_v33  ;;  %v760_v40 = vmul.f32 %v742_v52, %v742_v52 }
 0x15b   : > { %v579_v37 = vmul.f32 %v577_v25, %v575_v61  ;;  %v758_v55 = vadd.f32 %v756_v36, %v754_v35  ;;  %v775_v4 = vmul.f32 %v741_v38, %v739_v24  ;;  %v776_v5 = vmul.f32 %v742_v52, %v740_v46 }
 0x15c   : > { %v580_v42 = vmul.f32 %v1280_v43, %v578_v53  ;;  %v761_v7 = vadd.f32 %v759_v54, %v757_v39  ;;  %v781_v45 = vmul.f32 %v741_v38, %v1794_v56  ;;  %v782_v49 = vmul.f32 %v742_v52, %v1797_v57 }
 0x15d   : > { %v581_v62 = vmul.f32 %v1282_v32, %v579_v37  ;;  %v762_v58 = vadd.f32 %v760_v40, %v758_v55  ;;  %v777_v60 = vsub.f32 %v775_v4, %v1834_v12  ;;  %v792_v30 = vmul.f32 %v723_v8, %v1797_v57 }
 0x15e   : > { %v1863_v6 = vclamps-f32 %v580_v42, 1.0  ;;  %v1870_v11 = vadd.f32 %v763_v1, %v761_v7  ;;  %v785_v61 = vsub.f32 %v781_v45, %v783_v41  ;;  %v778_v31 = vsub.f32 %v776_v5, %v1838_v59 }
 0x15f   : > { %v1867_v9 = vclamps-f32 %v581_v62, 1.0  ;;  %v1876_v21 = vadd.f32 %v764_v48, %v762_v58  ;;  %v786_v32 = vsub.f32 %v782_v49, %v784_v28  ;;  %v793_v12 = vmul.f32 %v739_v24, %v1808_v34 }
 0x160   : > { %v586_v10 = vadd.f32 1.0, %v1863_v6  ;;  %v767_v38 = vmax.f32 %v1870_v11, 1e-20  ;;  %v794_v63 = vmul.f32 %v740_v46, %v1811_v3  ;;  %v779_v53 = vmul.f32 %v777_v60, %v737_v23 }
 0x161   : > { %v587_v20 = vadd.f32 1.0, %v1867_v9  ;;  %v768_v25 = vmax.f32 %v1876_v21, 1e-20  ;;  %v787_v8 = vmul.f32 %v785_v61, %v1794_v56  ;;  %v795_v0 = vsub.f32 %v791_v14, %v793_v12 }
 0x162   : > { %v588_v43 = vmul.f32 0.5, %v586_v10  ;;  %v769_v33 = vmul.f32 0.16666667, %v767_v38  ;;  %v780_v37 = vmul.f32 %v778_v31, %v738_v51  ;;  %v788_v59 = vmul.f32 %v786_v32, %v1797_v57 }
 0x163   : > { %v589_v50 = vmul.f32 0.5, %v587_v20  ;;  %v770_v41 = vmul.f32 0.16666667, %v768_v25  ;;  %v796_v28 = vsub.f32 %v792_v30, %v794_v63  ;;  %v789_v36 = vsub.f32 %v779_v53, %v787_v8 }
 0x164   : > { %v590_v52 = vmax.f32 %v588_v43, 0.0  ;;  %v797_v24 = vmul.f32 %v795_v0, %v1808_v34  ;;  %v790_v46 = vsub.f32 %v780_v37, %v788_v59  ;;  %vm907_vm2 = vcmp.gt.f32.partialorder %v1870_v11, 1e-12 }
 0x165   : > { %v591_v35 = vmax.f32 %v589_v50, 0.0  ;;  %v798_v54 = vmul.f32 %v796_v28, %v1811_v3  ;;  %vm908_vm3 = vcmp.gt.f32.partialorder %v1876_v21, 1e-12 }
 0x166   : > { %1283 = vrsqrt.f32 %v590_v52  ;;  %v799_v23 = vadd.f32 %v797_v24, %v789_v36  ;;  %vm594_vm6 = vcmp.eq.f32.partialorder %v590_v52, inf  ;;  %vm596_vm7 = vcmp.eq.f32.partialorder %v590_v52, 0.0 }
 0x167   : > { %1285 = vrsqrt.f32 %v591_v35  ;;  %v800_v1 = vadd.f32 %v798_v54, %v790_v46  ;;  %v597_v56 = vand.u32 2147483648, %v590_v52  ;;  %vm601_vm8 = vcmp.eq.f32.partialorder %v591_v35, inf }
 0x168   : > { %1287 = vrsqrt.f32 %v769_v33  ;;  %v604_v57 = vand.u32 2147483648, %v591_v35  ;;  %v801_v40 = vmul.f32 0.5, %v799_v23  ;;  %vm603_vm9 = vcmp.eq.f32.partialorder %v591_v35, 0.0 }
 0x169   : > { %1289 = vrsqrt.f32 %v770_v41  ;;  %v802_v55 = vmul.f32 0.5, %v800_v1 }
 0x170   : > { %v1284_v42 = vpop.eup %1283 }
 0x171   : > { %v1286_v39 = vpop.eup %1285  ;;  %v593_v51 = vmul.f32 %v1284_v42, %v590_v52 }
 0x172   : > { %v1288_v48 = vpop.eup %1287  ;;  %v600_v62 = vmul.f32 %v1286_v39, %v591_v35 }
 0x173   : > { %v1290_v4 = vpop.eup %1289  ;;  %v595_v34 = vsel %vm594_vm6, %v590_v52, %v593_v51  ;;  %v1888_v5 = vmul.f32 %v1288_v48, %v769_v33  ;;  %v803_v3 = vmul.f32 %v1288_v48, %v1288_v48 }
 0x174   : > { %v598_v7 = vsel %vm596_vm7, %v597_v56, %v595_v34  ;;  %v602_v45 = vsel %vm601_vm8, %v591_v35, %v600_v62  ;;  %v1890_v49 = vmul.f32 %v1290_v4, %v770_v41  ;;  %v804_v58 = vmul.f32 %v1290_v4, %v1290_v4 }
 0x175   : > { %v605_v10 = vsel %vm603_vm9, %v604_v57, %v602_v45  ;;  %v606_v60 = vmul.f32 0.022868298, %v598_v7  ;;  %v805_v14 = vmul.f32 %v803_v3, %v801_v40 }
 0x176   : > { %v607_v20 = vmul.f32 0.022868298, %v605_v10  ;;  %v806_v61 = vmul.f32 %v804_v58, %v802_v55 }
 0x177   : > { %v608_v30 = vadd.f32 -0.03292181, %v606_v60  ;;  %v807_v43 = vmul.f32 %v1288_v48, %v805_v14 }
 0x178   : > { %v609_v38 = vadd.f32 -0.03292181, %v607_v20  ;;  %v808_v31 = vmul.f32 %v1290_v4, %v806_v61 }
 0x179   : > { %v610_v32 = vmul.f32 %v608_v30, %v598_v7  ;;  %v1892_v50 = vclamps-f32 %v807_v43, 1.0 }
 0x17a   : > { %v611_v25 = vmul.f32 %v609_v38, %v605_v10  ;;  %v1894_v12 = vclamps-f32 %v808_v31, 1.0 }
 0x17b   : > { %v612_v63 = vadd.f32 0.05345836, %v610_v32  ;;  %v813_v52 = vadd.f32 1.0, %v1892_v50 }
 0x17c   : > { %v613_v33 = vadd.f32 0.05345836, %v611_v25  ;;  %v814_v53 = vadd.f32 1.0, %v1894_v12 }
 0x17d   : > { %v614_v35 = vmul.f32 %v612_v63, %v598_v7  ;;  %v815_v41 = vmul.f32 0.5, %v813_v52 }
 0x17e   : > { %v615_v8 = vmul.f32 %v613_v33, %v605_v10  ;;  %v816_v0 = vmul.f32 0.5, %v814_v53 }
 0x17f   : > { %v616_v37 = vadd.f32 -0.11111111, %v614_v35  ;;  %v817_v59 = vmax.f32 %v815_v41, 0.0 }
 0x180   : > { %v617_v28 = vadd.f32 -0.11111111, %v615_v8  ;;  %v818_v36 = vmax.f32 %v816_v0, 0.0 }
 0x181   : > { %v618_v24 = vmul.f32 %v616_v37, %v598_v7  ;;  %1291 = vrsqrt.f32 %v817_v59  ;;  %vm821_vm10 = vcmp.eq.f32.partialorder %v817_v59, inf  ;;  %vm823_vm11 = vcmp.eq.f32.partialorder %v817_v59, 0.0 }
 0x182   : > { %v619_v46 = vmul.f32 %v617_v28, %v605_v10  ;;  %1293 = vrsqrt.f32 %v818_v36  ;;  %v824_v62 = vand.u32 2147483648, %v817_v59  ;;  %vm828_vm12 = vcmp.eq.f32.partialorder %v818_v36, inf }
 0x183   : > { %v620_v54 = vadd.f32 0.57735026, %v618_v24  ;;  %v831_v45 = vand.u32 2147483648, %v818_v36  ;;  %vm830_vm13 = vcmp.eq.f32.partialorder %v818_v36, 0.0 }
 0x184   : > { %v621_v23 = vadd.f32 0.57735026, %v619_v46 }
 0x185   : > { %v622_v1 = vmul.f32 %v620_v54, %v598_v7 }
 0x186   : > { %v623_v42 = vmul.f32 %v621_v23, %v605_v10 }
 0x187   : > { %v624_v56 = vadd.f32 0.5, %v622_v1 }
 0x188   : > { %v625_v39 = vadd.f32 0.5, %v623_v42 }
 0x189   : > { %v626_v51 = vmul.f32 %v624_v56, %v624_v56 }
 0x18a   : > { %v627_v57 = vmul.f32 %v625_v39, %v625_v39 }
 0x18b   : > { %v1292_v40 = vpop.eup %1291  ;;  %v636_v48 = vmul.f32 12.0, %v626_v51  ;;  %v628_v4 = vmul.f32 4.0, %v626_v51 }
 0x18c   : > { %v1294_v55 = vpop.eup %1293  ;;  %v637_v34 = vmul.f32 12.0, %v627_v57  ;;  %v820_v3 = vmul.f32 %v1292_v40, %v817_v59  ;;  %v629_v58 = vmul.f32 4.0, %v627_v57 }
 0x18d   : > { %v1162_v60 = vadd.f32 -3.0, %v636_v48  ;;  %v827_v14 = vmul.f32 %v1294_v55, %v818_v36  ;;  %v1160_v43 = vadd.f32 -3.0, %v628_v4 }
 0x18e   : > { %v1163_v7 = vadd.f32 -3.0, %v637_v34  ;;  %v822_v10 = vsel %vm821_vm10, %v817_v59, %v820_v3  ;;  %v1161_v25 = vadd.f32 -3.0, %v629_v58 }
 0x18f   : > { %v640_v20 = vmax.f32 %v1162_v60, 0.01  ;;  %v825_v61 = vsel %vm823_vm11, %v824_v62, %v822_v10  ;;  %v829_v30 = vsel %vm828_vm12, %v818_v36, %v827_v14  ;;  %v632_v53 = vmul.f32 %v1160_v43, %v624_v56 }
 0x190   : > { %v641_v38 = vmax.f32 %v1163_v7, 0.01  ;;  %v832_v31 = vsel %vm830_vm13, %v831_v45, %v829_v30  ;;  %v833_v32 = vmul.f32 0.022868298, %v825_v61  ;;  %v633_v41 = vmul.f32 %v1161_v25, %v625_v39 }
 0x191   : > { %1295 = vrcp.f32 %v640_v20  ;;  %v834_v63 = vmul.f32 0.022868298, %v832_v31  ;;  %v634_v59 = vsub.f32 %v632_v53, %v1863_v6 }
 0x192   : > { %1297 = vrcp.f32 %v641_v38  ;;  %v835_v52 = vadd.f32 -0.03292181, %v833_v32  ;;  %v635_v36 = vsub.f32 %v633_v41, %v1867_v9 }
 0x193   : > { %v836_v33 = vadd.f32 -0.03292181, %v834_v63 }
 0x194   : > { %v837_v35 = vmul.f32 %v835_v52, %v825_v61 }
 0x195   : > { %v838_v8 = vmul.f32 %v836_v33, %v832_v31 }
 0x196   : > { %v839_v0 = vadd.f32 0.05345836, %v837_v35 }
 0x197   : > { %v840_v37 = vadd.f32 0.05345836, %v838_v8 }
 0x198   : > { %v841_v28 = vmul.f32 %v839_v0, %v825_v61 }
 0x199   : > { %v842_v24 = vmul.f32 %v840_v37, %v832_v31 }
 0x19a   : > { %v843_v46 = vadd.f32 -0.11111111, %v841_v28 }
 0x19b   : > { %v1296_v54 = vpop.eup %1295  ;;  %v844_v23 = vadd.f32 -0.11111111, %v842_v24 }
 0x19c   : > { %v1298_v1 = vpop.eup %1297  ;;  %v644_v42 = vmul.f32 %v1296_v54, %v634_v59  ;;  %v845_v51 = vmul.f32 %v843_v46, %v825_v61 }
 0x19d   : > { %v645_v57 = vmul.f32 %v1298_v1, %v635_v36  ;;  %v846_v40 = vmul.f32 %v844_v23, %v832_v31 }
 0x19e   : > { %v646_v48 = vsub.f32 %v624_v56, %v644_v42  ;;  %v847_v62 = vadd.f32 0.57735026, %v845_v51 }
 0x19f   : > { %v647_v55 = vsub.f32 %v625_v39, %v645_v57  ;;  %v848_v4 = vadd.f32 0.57735026, %v846_v40 }
 0x1a0   : > { %v648_v34 = vmul.f32 %v646_v48, %v646_v48  ;;  %v849_v3 = vmul.f32 %v847_v62, %v825_v61 }
 0x1a1   : > { %v649_v45 = vmul.f32 %v647_v55, %v647_v55  ;;  %v850_v58 = vmul.f32 %v848_v4, %v832_v31 }
 0x1a2   : > { %v658_v60 = vmul.f32 12.0, %v648_v34  ;;  %v851_v14 = vadd.f32 0.5, %v849_v3  ;;  %v650_v7 = vmul.f32 4.0, %v648_v34 }
 0x1a3   : > { %v659_v10 = vmul.f32 12.0, %v649_v45  ;;  %v852_v20 = vadd.f32 0.5, %v850_v58  ;;  %v651_v30 = vmul.f32 4.0, %v649_v45 }
 0x1a4   : > { %v1166_v43 = vadd.f32 -3.0, %v658_v60  ;;  %v853_v38 = vmul.f32 %v851_v14, %v851_v14  ;;  %v1164_v56 = vadd.f32 -3.0, %v650_v7  ;;  %v674_v60 = vmul.f32 2.0, %v1855_v44 }
 0x1a5   : > { %v1167_v32 = vadd.f32 -3.0, %v659_v10  ;;  %v854_v25 = vmul.f32 %v852_v20, %v852_v20  ;;  %v1165_v35 = vadd.f32 -3.0, %v651_v30 }
 0x1a6   : > { %v662_v63 = vmax.f32 %v1166_v43, 0.01  ;;  %v863_v52 = vmul.f32 12.0, %v853_v38  ;;  %v855_v39 = vmul.f32 4.0, %v853_v38  ;;  %v654_v0 = vmul.f32 %v1164_v56, %v646_v48 }
 0x1a7   : > { %v663_v33 = vmax.f32 %v1167_v32, 0.01  ;;  %v864_v53 = vmul.f32 12.0, %v854_v25  ;;  %v856_v61 = vmul.f32 4.0, %v854_v25  ;;  %v655_v28 = vmul.f32 %v1165_v35, %v647_v55 }
 0x1a8   : > { %1299 = vrcp.f32 %v662_v63  ;;  %v1182_v31 = vadd.f32 -3.0, %v863_v52  ;;  %v1180_v37 = vadd.f32 -3.0, %v855_v39  ;;  %v656_v24 = vsub.f32 %v654_v0, %v1863_v6 }
 0x1a9   : > { %1301 = vrcp.f32 %v663_v33  ;;  %v1183_v41 = vadd.f32 -3.0, %v864_v53  ;;  %v1181_v36 = vadd.f32 -3.0, %v856_v61  ;;  %v657_v54 = vsub.f32 %v655_v28, %v1867_v9 }
 0x1aa   : > { %v867_v8 = vmax.f32 %v1182_v31, 0.01  ;;  %v859_v46 = vmul.f32 %v1180_v37, %v851_v14  ;;  %v675_v9 = vmul.f32 2.0, %v1859_v47  ;;  %v686_v47 = vmul.f32 0.5, %v1744_v17 }
 0x1ab   : > { %v868_v59 = vmax.f32 %v1183_v41, 0.01  ;;  %v860_v23 = vmul.f32 %v1181_v36, %v852_v20 }
 0x1ac   : > { %1303 = vrcp.f32 %v867_v8  ;;  %v861_v57 = vsub.f32 %v859_v46, %v1892_v50 }
 0x1ad   : > { %1305 = vrcp.f32 %v868_v59  ;;  %v862_v62 = vsub.f32 %v860_v23, %v1894_v12 }
 0x1b2   : > { %v1300_v1 = vpop.eup %1299 }
 0x1b3   : > { %v1302_v42 = vpop.eup %1301  ;;  %v666_v51 = vmul.f32 %v1300_v1, %v656_v24 }
 0x1b4   : > { %v667_v40 = vmul.f32 %v1302_v42, %v657_v54 }
 0x1b5   : > { %v668_v4 = vsub.f32 %v646_v48, %v666_v51  ;;  %v901_v51 = vmul.f32 2.0, %v1888_v5 }
 0x1b6   : > { %v1304_v34 = vpop.eup %1303  ;;  %v669_v3 = vsub.f32 %v647_v55, %v667_v40  ;;  %v902_v40 = vmul.f32 2.0, %v1890_v49 }
 0x1b7   : > { %v1306_v45 = vpop.eup %1305  ;;  %v670_v58 = vmax.f32 %v668_v4, 0.5  ;;  %v871_v6 = vmul.f32 %v1304_v34, %v861_v57 }
 0x1b8   : > { %v671_v7 = vmax.f32 %v669_v3, 0.5  ;;  %v872_v10 = vmul.f32 %v1306_v45, %v862_v62 }
 0x1b9   : > { %v672_v30 = vmin.f32 %v670_v58, 1.0  ;;  %v873_v43 = vsub.f32 %v851_v14, %v871_v6  ;;  %v446_v58 = vld [vmem:[%s1609_s18 + $0x8] sm:$0xf]  ;;  %v445_v6 = vld [vmem:[%s1609_s18] sm:$0xff] }
 0x1ba   : > { %v673_v38 = vmin.f32 %v671_v7, 1.0  ;;  %v874_v32 = vsub.f32 %v852_v20, %v872_v10  ;;  %v687_v20 = vmul.f32 0.5, %v1746_v18  ;;  %vm448_vm4 = vcmp.eq.f32.partialorder %v446_v58, 1.0 }
 0x1bb   : > { %v676_v25 = vmul.f32 %v674_v60, %v672_v30  ;;  %v875_v63 = vmul.f32 %v873_v43, %v873_v43  ;;  %vm447_vm5 = vcmp.eq.f32.partialorder %v445_v6, 1.0  ;;  %vm450_vm6 = vmand %vm448_vm4, %vm414_vm0 }
 0x1bc   : > { %v677_v52 = vmul.f32 %v675_v9, %v673_v38  ;;  %v876_v48 = vmul.f32 %v874_v32, %v874_v32 }
 0x1bd   : > { %v678_v55 = vadd.f32 %v676_v25, %v1753_v26  ;;  %v885_v44 = vmul.f32 12.0, %v875_v63  ;;  %v877_v33 = vmul.f32 4.0, %v875_v63 }
 0x1be   : > { %v679_v56 = vadd.f32 %v677_v52, %v1756_v27  ;;  %v886_v39 = vmul.f32 12.0, %v876_v48  ;;  %v878_v53 = vmul.f32 4.0, %v876_v48 }
 0x1bf   : > { %v682_v14 = vsel %vm680_vm14, %v678_v55, %v1753_v26  ;;  %v1186_v35 = vadd.f32 -3.0, %v885_v44  ;;  %v1184_v0 = vadd.f32 -3.0, %v877_v33 }
 0x1c0   : > { %v683_v15 = vsel %vm681_vm15, %v679_v56, %v1756_v27  ;;  %v684_v61 = vmul.f32 1.5, %v682_v14  ;;  %v1187_v31 = vadd.f32 -3.0, %v886_v39  ;;  %v1185_v28 = vadd.f32 -3.0, %v878_v53 }
 0x1c1   : > { %v685_v41 = vmul.f32 1.5, %v683_v15  ;;  %v889_v8 = vmax.f32 %v1186_v35, 0.01  ;;  %v881_v17 = vmul.f32 %v1184_v0, %v873_v43 }
 0x1c2   : > { %v688_v16 = vsub.f32 %v684_v61, %v686_v47  ;;  %v890_v37 = vmax.f32 %v1187_v31, 0.01  ;;  %v882_v36 = vmul.f32 %v1185_v28, %v874_v32 }
 0x1c3   : > { %v689_v59 = vsub.f32 %v685_v41, %v687_v20  ;;  %1307 = vrcp.f32 %v889_v8  ;;  %v883_v26 = vsub.f32 %v881_v17, %v1892_v50 }
 0x1c4   : > { %1309 = vrcp.f32 %v890_v37  ;;  %v884_v18 = vsub.f32 %v882_v36, %v1894_v12 }
 0x1cd   : > { %v1308_v24 = vpop.eup %1307 }
 0x1ce   : > { %v1310_v46 = vpop.eup %1309  ;;  %v893_v27 = vmul.f32 %v1308_v24, %v883_v26 }
 0x1cf   : > { %v894_v54 = vmul.f32 %v1310_v46, %v884_v18 }
 0x1d0   : > { %v895_v23 = vsub.f32 %v873_v43, %v893_v27 }
 0x1d1   : > { %v896_v1 = vsub.f32 %v874_v32, %v894_v54 }
 0x1d2   : > { %v897_v42 = vmax.f32 %v895_v23, 0.5 }
 0x1d3   : > { %v898_v57 = vmax.f32 %v896_v1, 0.5 }
 0x1d4   : > { %v899_v62 = vmin.f32 %v897_v42, 1.0 }
 0x1d5   : > { %v900_v4 = vmin.f32 %v898_v57, 1.0 }
 0x1d6   : > { %v903_v34 = vmul.f32 %v901_v51, %v899_v62 }
 0x1d7   : > { %v904_v50 = vmul.f32 %v902_v40, %v900_v4 }
 0x1d8   : > { %v905_v12 = vadd.f32 %v903_v34, %v1843_v22 }
 0x1d9   : > { %v906_v3 = vadd.f32 %v904_v50, %v1846_v29 }
 0x1da   : > { %v909_v45 = vsel %vm907_vm2, %v905_v12, %v1843_v22 }
 0x1db   : > { %v910_v5 = vsel %vm908_vm3, %v906_v3, %v1846_v29  ;;  %v911_v60 = vsub.f32 %v1836_v13, %v909_v45 }
 0x1dc   : > { %v912_v49 = vsub.f32 %v1840_v19, %v910_v5 }
 0x1dd   : > { %v913_v7 = vmul.f32 0.5, %v911_v60 }
 0x1de   : > { %v914_v9 = vmul.f32 0.5, %v912_v49 }
 0x1df   : > { %v915_v11 = vsub.f32 %v688_v16, %v913_v7 }
 0x1e0   : > { %v916_v10 = vsub.f32 %v689_v59, %v914_v9 }
 0x1e1   : > { %v917_v21 = vand.u32 2147483647, %v915_v11 }
 0x1e2   : > { %v918_v22 = vand.u32 2147483647, %v916_v10 }
 0x1e3   : > { %v919_v30 = vsel %vm447_vm5, %v917_v21, 0.0 }
 0x1e4   : > { %v920_v43 = vsel %vm450_vm6, %v918_v22, 0.0 }
 0x1e5   : > { %v921_v29 = vsel %vm419_vm1, %v920_v43, 0.0 }
 0x1e6   : > { %v922_v13 = vadd.f32 %v921_v29, %v919_v30 }
 0x1e8   : > { %v923_v38 = vrot.slane %v922_v13, 4 }
 0x1ea   : > { %v924_v19 = vadd.f32 %v923_v38, %v922_v13 }
 0x1ec   : > { %v925_v32 = vrot.slane %v924_v19, 2 }
 0x1ee   : > { %v926_v25 = vadd.f32 %v925_v32, %v924_v19 }
 0x1f0   : > { %v927_v63 = vrot.slane %v926_v25, 1 }
 0x1f2   : > { %v928_v52 = vadd.f32 %v927_v63, %v926_v25 }
 0x1f4   : > { %930 = vst [vmem:[%s1654_s4] sm:$0x1] %v928_v52 }
 0x1f5 PF: > { %p931_p10 = scmp.eq.f32.partialorder %s1650_s3, 0.0 }
 0x1f6   : > { %v1464_v2 = vmov (%p931_p10), 0.0  }
 0x1f7   : > { %934 = sbr.rel (!%p931_p10) target bundleno = 510 (0x1fe), region = 56  ;;  %935 = vst [vmem:[%s1654_s4] sm:$0x1] (%p931_p10), %v1464_v2 }
 0x1fe PF: > { %s1188_s1 = sshll.u32 %s1451_s24, 4  ;;  %s954_s19 = sshll.u32 %s1654_s4, 4  ;;  %s955_s19 = int_to_ptr.vmem [resolvable:$true] %s954_s19 }
 0x1ff   : > { %s1941_s18 = scalar_lea.hbm %s2016_s5, %s1188_s1  ;;  %s937_s3 = scalar_lea.sflag [#allocation3], %s1596_s8 }
 0x200   : > { %s1341_s28 = scalar_lea.vmem %s955_s19, 16  ;;  %p2039_p13 = scmp.ne.s32.totalorder %s2027_s7, 0 }
 0x201   : > { %p1342_p11 = scmp.ne.s32.totalorder %s955_s19, %s1341_s28  ;;  %s1465_s11 = smov [#allocation7]  }
 0x202   : > { %s1345_s16 = sshll.u32 %s1465_s11, 4  ;;  %s1346_s16 = int_to_ptr.vmem [resolvable:$false] %s1345_s16 }
 0x203   : > { %p1343_p1 = pnand %p1342_p11, %p2039_p13  ;;  %s1347_s12 = scalar_lea.vmem %s1346_s16, 32 }
 0x204   : > { %p1348_p7 = scmp.lt.s32.totalorder %s955_s19, %s1346_s16  ;;  %p1349_p9 = scmp.lt.s32.totalorder %s1347_s12, %s1341_s28 }
 0x205   : > { %p1344_p6 = pneg %p1343_p1 }
 0x206   : > { %p1350_p12 = por %p1349_p9, %p1348_p7 }
 0x208   : > { %p1351_p0 = pnand %p1350_p12, %p1344_p6 }
 0x20a   : > { %1354 = shalt.err (!%p1351_p0)
}
 0x20b   : > { %s1355_s4 = scalar_lea.hbm %s1941_s18, 16  ;;  %s1359_s0 = scalar_lea.hbm %s2016_s5, 32 }
 0x20c   : > { %p1356_p2 = scmp.ne.s32.totalorder %s1941_s18, %s1355_s4  ;;  %p1360_p4 = scmp.lt.u32.totalorder %s1941_s18, %s2016_s5 }
 0x20d   : > { %p1361_p8 = scmp.lt.u32.totalorder %s1359_s0, %s1355_s4  ;;  %p1363_p11 = scmp.lt.u32.totalorder %s1355_s4, %s1941_s18 }
 0x20e   : > { %p1357_p3 = pnand %p1356_p2, %p2039_p13 }
 0x20f   : > { %p1362_p10 = por %p1361_p8, %p1360_p4 }
 0x210   : > { %p1358_p5 = pneg %p1357_p3 }
 0x211   : > { %p1364_p1 = por %p1363_p11, %p1362_p10 }
 0x213   : > { %p1365_p6 = pnand %p1364_p1, %p1358_p5 }
 0x215   : > { %1368 = shalt.err (!%p1365_p6)
}
 0x216   : > { %1204 = dma.vmem_to_hbm [thread:$0]  (%p2039_p13), %s955_s19, 16, %s1941_s18, %s937_s3  }
 0x217   : > { %s1967_s14 = scalar_lea.hbm %s2017_s6, %s1188_s1  ;;  %s968_s28 = sshll.u32 %s359_s2, 4  ;;  %s969_s28 = int_to_ptr.vmem [resolvable:$true] %s968_s28 }
 0x218   : > { %s941_s11 = scalar_lea.sflag [#allocation9], %s1596_s8  ;;  %s1369_s16 = scalar_lea.vmem %s969_s28, 16 }
 0x219   : > { %p1370_p7 = scmp.ne.s32.totalorder %s969_s28, %s1369_s16  ;;  %s1466_s12 = smov [#allocation8]  }
 0x21a   : > { %s1373_s4 = sshll.u32 %s1466_s12, 4  ;;  %s1374_s4 = int_to_ptr.vmem [resolvable:$false] %s1373_s4 }
 0x21b   : > { %p1371_p9 = pnand %p1370_p7, %p2039_p13  ;;  %s1375_s17 = scalar_lea.vmem %s1374_s4, 32 }
 0x21c   : > { %p1376_p0 = scmp.lt.s32.totalorder %s969_s28, %s1374_s4  ;;  %p1377_p2 = scmp.lt.s32.totalorder %s1375_s17, %s1369_s16 }
 0x21d   : > { %p1372_p12 = pneg %p1371_p9 }
 0x21e   : > { %p1378_p3 = por %p1377_p2, %p1376_p0 }
 0x220   : > { %p1379_p5 = pnand %p1378_p3, %p1372_p12 }
 0x222   : > { %1382 = shalt.err (!%p1379_p5)
}
 0x223   : > { %s1383_s2 = scalar_lea.hbm %s1967_s14, 16  ;;  %s1387_s1 = scalar_lea.hbm %s2017_s6, 32 }
 0x224   : > { %p1384_p4 = scmp.ne.s32.totalorder %s1967_s14, %s1383_s2  ;;  %p1388_p11 = scmp.lt.u32.totalorder %s1967_s14, %s2017_s6 }
 0x225   : > { %p1389_p1 = scmp.lt.u32.totalorder %s1387_s1, %s1383_s2  ;;  %p1391_p7 = scmp.lt.u32.totalorder %s1383_s2, %s1967_s14 }
 0x226   : > { %p1385_p8 = pnand %p1384_p4, %p2039_p13 }
 0x227   : > { %p1390_p6 = por %p1389_p1, %p1388_p11 }
 0x228   : > { %p1386_p10 = pneg %p1385_p8 }
 0x229   : > { %p1392_p9 = por %p1391_p7, %p1390_p6 }
 0x22b   : > { %p1393_p12 = pnand %p1392_p9, %p1386_p10 }
 0x22d   : > { %1396 = shalt.err (!%p1393_p12)
}
 0x22e   : > { %1205 = dma.vmem_to_hbm [thread:$0]  (%p2039_p13), %s969_s28, 16, %s1967_s14, %s941_s11  }
 0x22f PF: > { %p1226_p0 = scmp.ge.s32.totalorder %s1459_s26, 2  ;;  %s980_s3 = sand.u32 1, %s1439_s21  }
 0x230   : > { %p2040_p2 = scmp.ne.s32.totalorder %s2028_s9, 0  ;;  %s981_s20 = scalar_lea.sflag [#allocation3], %s980_s3 }
 0x232   : > { %p1216_p3 = pnand %p1226_p0, %p2040_p2 }
 0x234   : > { %1430 = dma.done.wait (!%p1216_p3), %s981_s20, 16  }
 0x235   : > { %1432 = vsyncadd (!%p1216_p3), %s981_s20, 4294967280  ;;  %s989_s0 = scalar_lea.sflag [#allocation9], %s980_s3 }
 0x236   : > { %1434 = dma.done.wait (!%p1216_p3), %s989_s0, 16  }
 0x237   : > { %1436 = vsyncadd (!%p1216_p3), %s989_s0, 4294967280  ;;  %s25_s26 = sadd.s32 1, %s1459_s26   ;;  %s2041_s21 = smov %s1443_s22 }
 0x238   : > { %p22_p5 = scmp.ge.s32.totalorder %s25_s26, 4   ;;  %s2042_s22 = smov %s1447_s23 }
 0x239   : > { %s2043_s23 = smov %s1555_s10  ;;  %s2044_s24 = smov %s1455_s25 }
 0x23a   : > { %s2045_s25 = smov %s2047_s29  ;;  %24 = sbr.rel (!%p22_p5) target bundleno = 14 (0xe), region = 125 }
 0x241   :  { %993 = vsyncpa [#allocation3], 1 }
 0x242   :  { %995 = vsyncpa [#allocation3 + $0x1], 1 }
 0x243   :  { %996 = vsyncpa [#allocation9], 1 }
 0x244   :  { %998 = vsyncpa [#allocation9 + $0x1], 1 }
 0x245   :  { %999 = vsyncpa [#allocation4], 1 }
 0x246   :  { %1001 = vsyncpa [#allocation4 + $0x1], 1 }
 0x247   :  { %1002 = vsyncpa [#allocation6], 1 }

</bundles_post_ra>
